<compile_context>
chip_gen: v6e
topology: v6e:2x2x1
jax: 0.10.0
libtpu: 0.0.40
codegen_flags: <defaults>
</compile_context>

<pallas_src>
import jax
import jax.numpy as jnp
from jax.experimental import pallas as pl
from jax.experimental.pallas import tpu as pltpu

# --- logical dims (from the PyTorch module) ---
D_IN = 100            # x1 / x2 feature dim
D0 = 2 * D_IN         # 200  MLP input dim
D1 = 400              # MLP hidden dim
D2 = 200              # MLP output dim
D_OUT = 2             # logits

# --- lane-padded dims used by the fused kernel (multiples of 128) ---
P1 = 512              # padded per-MLP hidden   (400 -> 512)
P2 = 256              # padded per-MLP output   (200 -> 256)
P_OUT = 128           # padded logits           (2   -> 128)
H1W = 2 * P1          # 1024: fused layer-1 width  [mlp1 | mlp2]
H2W = 2 * P2          # 512 : fused layer-2 width  [h1   | h2  ]
BW = H1W + H2W + P_OUT  # 1664: packed bias row width


def _deepsim_kernel(x1_ref, x2_ref, wa_ref, w2_ref, wl_ref, b_ref, out_ref):
    B = x1_ref.shape[0]

    # ---- fused layer 1 for BOTH MLPs, split-K over the virtual concats ----
    #   cols   0..P1-1   : x12 @ W1a   (mlp1 layer 0)
    #   cols  P1..2P1-1  : x21 @ W1b   (mlp2 layer 0)
    z1 = jnp.dot(x1_ref[...], wa_ref[:, :H1W],
                 preferred_element_type=jnp.float32)
    z1 = z1 + jnp.dot(x2_ref[...], wa_ref[:, H1W:],
                      preferred_element_type=jnp.float32)
    a1 = jnp.maximum(z1 + b_ref[:, :H1W], 0.0)                # (B, 1024)

    # ---- fused layer 2 (block-diagonal weights) ----
    #   cols   0..P2-1  : h1 = relu(a1[:, :P1] @ W2a + b2a)
    #   cols  P2..2P2-1 : h2 = relu(a1[:, P1:] @ W2b + b2b)
    z2 = jnp.dot(a1, w2_ref[...], preferred_element_type=jnp.float32)
    h = jnp.maximum(z2 + b_ref[:, H1W:H1W + H2W], 0.0)        # (B, 512)

    # ---- mean over concat([h1, h2], axis=0) -> (1, 256) ----
    h_pair = h[:, :P2] + h[:, P2:]                            # (B, 256)
    h_mean = jnp.sum(h_pair, axis=0, keepdims=True) * (1.0 / (2.0 * B))

    # ---- final linear (200 -> 2), lane-dense padded to 128 output lanes ----
    out_ref[...] = (jnp.dot(h_mean, wl_ref[...],
                            preferred_element_type=jnp.float32)
                    + b_ref[:, H1W + H2W:])


def deepsim_forward(x1, x2, hist, packed_params):
    # `hist` is unused by the reference forward; accepted for signature parity.
    del hist
    wa, w2, wlp, b_all = packed_params
    vmem = pl.BlockSpec(memory_space=pltpu.MemorySpace.VMEM)
    out_pad = pl.pallas_call(
        _deepsim_kernel,
        out_shape=jax.ShapeDtypeStruct((1, P_OUT), jnp.float32),
        in_specs=[vmem] * 6,
        out_specs=vmem,
    )(x1.astype(jnp.float32), x2.astype(jnp.float32), wa, w2, wlp, b_all)
    return out_pad[:, :D_OUT]


def init_params(key):
    """Raw params matching PyTorch nn.Linear shapes.

    Weights stored as (in_features, out_features); biases as (1, out)."""
    def linear(k, fan_in, fan_out):
        kw, kb = jax.random.split(k)
        bound = 1.0 / jnp.sqrt(jnp.float32(fan_in))
        w = jax.random.uniform(kw, (fan_in, fan_out), jnp.float32, -bound, bound)
        b = jax.random.uniform(kb, (1, fan_out), jnp.float32, -bound, bound)
        return w, b

    keys = jax.random.split(key, 5)
    w1a, b1a = linear(keys[0], D0, D1)   # mlp1 layer 0
    w2a, b2a = linear(keys[1], D1, D2)   # mlp1 layer 1
    w1b, b1b = linear(keys[2], D0, D1)   # mlp2 layer 0
    w2b, b2b = linear(keys[3], D1, D2)   # mlp2 layer 1
    wl, bl = linear(keys[4], D2, D_OUT)  # final linear
    return (w1a, b1a, w2a, b2a, w1b, b1b, w2b, b2b, wl, bl)


def pack_params(params):
    """Pack/pad params into 4 lane-dense arrays for the fused kernel."""
    (w1a, b1a, w2a, b2a, w1b, b1b, w2b, b2b, wl, bl) = params

    # Fused layer-1 weights, pre-split over the virtual [x1|x2] / [x2|x1] concat:
    #   wa[:,     0:H1W ] multiplies x1;   wa[:, H1W:2*H1W] multiplies x2.
    wa = jnp.zeros((D_IN, 2 * H1W), jnp.float32)
    wa = wa.at[:, 0:D1].set(w1a[:D_IN, :])                     # x1 -> mlp1 (W1a rows 0..99)
    wa = wa.at[:, P1:P1 + D1].set(w1b[D_IN:, :])               # x1 -> mlp2 (W1b rows 100..199)
    wa = wa.at[:, H1W:H1W + D1].set(w1a[D_IN:, :])             # x2 -> mlp1 (W1a rows 100..199)
    wa = wa.at[:, H1W + P1:H1W + P1 + D1].set(w1b[:D_IN, :])   # x2 -> mlp2 (W1b rows 0..99)

    # Fused layer-2 weights: block-diagonal [[W2a, 0], [0, W2b]], zero padded.
    w2 = jnp.zeros((H1W, H2W), jnp.float32)
    w2 = w2.at[0:D1, 0:D2].set(w2a)
    w2 = w2.at[P1:P1 + D1, P2:P2 + D2].set(w2b)

    # Final projection padded to a lane-dense (256, 128) tile.
    wlp = jnp.zeros((P2, P_OUT), jnp.float32)
    wlp = wlp.at[0:D2, 0:D_OUT].set(wl)

    # All biases packed into a single lane-dense row: [bias1 | bias2 | bias_out].
    b_all = jnp.zeros((1, BW), jnp.float32)
    b_all = b_all.at[:, 0:D1].set(b1a)
    b_all = b_all.at[:, P1:P1 + D1].set(b1b)
    b_all = b_all.at[:, H1W:H1W + D2].set(b2a)
    b_all = b_all.at[:, H1W + P2:H1W + P2 + D2].set(b2b)
    b_all = b_all.at[:, H1W + H2W:H1W + H2W + D_OUT].set(bl)

    return wa, w2, wlp, b_all


def deepsim_ref(x1, x2, params):
    """Pure-JAX reference for correctness check (mirrors the PyTorch forward)."""
    (w1a, b1a, w2a, b2a, w1b, b1b, w2b, b2b, wl, bl) = params
    x12 = jnp.concatenate([x1, x2], axis=1)
    x21 = jnp.concatenate([x2, x1], axis=1)
    h1 = jax.nn.relu(jax.nn.relu(x12 @ w1a + b1a) @ w2a + b2a)
    h2 = jax.nn.relu(jax.nn.relu(x21 @ w1b + b1b) @ w2b + b2b)
    h = jnp.mean(jnp.concatenate([h1, h2], axis=0), axis=0, keepdims=True)
    return h @ wl + bl


if __name__ == "__main__":
    key = jax.random.PRNGKey(0)
    k1, k2, k3, kp = jax.random.split(key, 4)

    B = 8
    x1 = jax.random.normal(k1, (B, D_IN), jnp.float32)
    x2 = jax.random.normal(k2, (B, D_IN), jnp.float32)
    hist = jax.random.normal(k3, (B, 16), jnp.float32)  # unused by forward

    params = init_params(kp)
    packed = pack_params(params)

    logits = deepsim_forward(x1, x2, hist, packed)
    logits = jax.block_until_ready(logits)

    ref = deepsim_ref(x1, x2, params)
    assert logits.shape == (1, D_OUT), logits.shape
    assert jnp.allclose(logits, ref, atol=1e-4, rtol=1e-4), (logits, ref)

    print("KERNEL_OK")
</pallas_src>

<mosaic_0001>
module attributes {stable_mosaic.version = 11 : i64} {
  func.func @_deepsim_kernel(%arg0: memref<8x100xf32, #tpu.memory_space<vmem>>, %arg1: memref<8x100xf32, #tpu.memory_space<vmem>>, %arg2: memref<100x2048xf32, #tpu.memory_space<vmem>>, %arg3: memref<1024x512xf32, #tpu.memory_space<vmem>>, %arg4: memref<256x128xf32, #tpu.memory_space<vmem>>, %arg5: memref<1x1664xf32, #tpu.memory_space<vmem>>, %arg6: memref<1x128xf32, #tpu.memory_space<vmem>>) attributes {dimension_semantics = [], scalar_prefetch = 0 : i64, scratch_operands = 0 : i64, tpu.core_type = #tpu.core_type<tc>} {
    %c0 = arith.constant 0 : index
    %c0_0 = arith.constant 0 : index
    %0 = vector.load %arg0[%c0, %c0_0] : memref<8x100xf32, #tpu.memory_space<vmem>>, vector<8x100xf32>
    %c0_1 = arith.constant 0 : index
    %c0_2 = arith.constant 0 : index
    %1 = vector.load %arg2[%c0_1, %c0_2] : memref<100x2048xf32, #tpu.memory_space<vmem>>, vector<100x1024xf32>
    %cst = arith.constant dense<0.000000e+00> : vector<8x1024xf32>
    %2 = tpu.matmul %0, %1, %cst {dimension_numbers = #tpu.dot_dimension_numbers<[1], [0], [0], [1], [0, 0, 1, 1], [], []>} : vector<8x100xf32>, vector<100x1024xf32>, vector<8x1024xf32> -> vector<8x1024xf32>
    %c0_3 = arith.constant 0 : index
    %c0_4 = arith.constant 0 : index
    %3 = vector.load %arg1[%c0_3, %c0_4] : memref<8x100xf32, #tpu.memory_space<vmem>>, vector<8x100xf32>
    %c0_5 = arith.constant 0 : index
    %c1024 = arith.constant 1024 : index
    %4 = vector.load %arg2[%c0_5, %c1024] : memref<100x2048xf32, #tpu.memory_space<vmem>>, vector<100x1024xf32>
    %cst_6 = arith.constant dense<0.000000e+00> : vector<8x1024xf32>
    %5 = tpu.matmul %3, %4, %cst_6 {dimension_numbers = #tpu.dot_dimension_numbers<[1], [0], [0], [1], [0, 0, 1, 1], [], []>} : vector<8x100xf32>, vector<100x1024xf32>, vector<8x1024xf32> -> vector<8x1024xf32>
    %6 = arith.addf %2, %5 : vector<8x1024xf32>
    %c0_7 = arith.constant 0 : index
    %c0_8 = arith.constant 0 : index
    %7 = vector.load %arg5[%c0_7, %c0_8] : memref<1x1664xf32, #tpu.memory_space<vmem>>, vector<1x1024xf32>
    %8 = vector.broadcast %7 : vector<1x1024xf32> to vector<8x1024xf32>
    %9 = arith.addf %6, %8 : vector<8x1024xf32>
    %cst_9 = arith.constant 0.000000e+00 : f32
    %10 = vector.broadcast %cst_9 : f32 to vector<8x1024xf32>
    %11 = arith.maximumf %9, %10 : vector<8x1024xf32>
    %c0_10 = arith.constant 0 : index
    %c0_11 = arith.constant 0 : index
    %12 = vector.load %arg3[%c0_10, %c0_11] : memref<1024x512xf32, #tpu.memory_space<vmem>>, vector<1024x512xf32>
    %cst_12 = arith.constant dense<0.000000e+00> : vector<8x512xf32>
    %13 = tpu.matmul %11, %12, %cst_12 {dimension_numbers = #tpu.dot_dimension_numbers<[1], [0], [0], [1], [0, 0, 1, 1], [], []>} : vector<8x1024xf32>, vector<1024x512xf32>, vector<8x512xf32> -> vector<8x512xf32>
    %c0_13 = arith.constant 0 : index
    %c1024_14 = arith.constant 1024 : index
    %14 = vector.load %arg5[%c0_13, %c1024_14] : memref<1x1664xf32, #tpu.memory_space<vmem>>, vector<1x512xf32>
    %15 = vector.broadcast %14 : vector<1x512xf32> to vector<8x512xf32>
    %16 = arith.addf %13, %15 : vector<8x512xf32>
    %cst_15 = arith.constant 0.000000e+00 : f32
    %17 = vector.broadcast %cst_15 : f32 to vector<8x512xf32>
    %18 = arith.maximumf %16, %17 : vector<8x512xf32>
    %19 = vector.extract_strided_slice %18 {offsets = [0, 0], sizes = [8, 256], strides = [1, 1]} : vector<8x512xf32> to vector<8x256xf32>
    %20 = vector.extract_strided_slice %18 {offsets = [0, 256], sizes = [8, 256], strides = [1, 1]} : vector<8x512xf32> to vector<8x256xf32>
    %21 = arith.addf %19, %20 : vector<8x256xf32>
    %cst_16 = arith.constant dense<0.000000e+00> : vector<256xf32>
    %22 = vector.multi_reduction <add>, %21, %cst_16 [0] : vector<8x256xf32> to vector<256xf32>
    %23 = vector.shape_cast %22 : vector<256xf32> to vector<1x256xf32>
    %cst_17 = arith.constant 6.250000e-02 : f32
    %24 = vector.broadcast %cst_17 : f32 to vector<1x256xf32>
    %25 = arith.mulf %23, %24 : vector<1x256xf32>
    %c0_18 = arith.constant 0 : index
    %c0_19 = arith.constant 0 : index
    %26 = vector.load %arg4[%c0_18, %c0_19] : memref<256x128xf32, #tpu.memory_space<vmem>>, vector<256x128xf32>
    %cst_20 = arith.constant dense<0.000000e+00> : vector<1x128xf32>
    %27 = tpu.matmul %25, %26, %cst_20 {dimension_numbers = #tpu.dot_dimension_numbers<[1], [0], [0], [1], [0, 0, 1, 1], [], []>} : vector<1x256xf32>, vector<256x128xf32>, vector<1x128xf32> -> vector<1x128xf32>
    %c0_21 = arith.constant 0 : index
    %c1536 = arith.constant 1536 : index
    %28 = vector.load %arg5[%c0_21, %c1536] : memref<1x1664xf32, #tpu.memory_space<vmem>>, vector<1x128xf32>
    %29 = arith.addf %27, %28 : vector<1x128xf32>
    %c0_22 = arith.constant 0 : index
    %c0_23 = arith.constant 0 : index
    %30 = vector.load %arg6[%c0_22, %c0_23] : memref<1x128xf32, #tpu.memory_space<vmem>>, vector<1x128xf32>
    tpu.vector_store %arg6[%c0_22, %c0_23], %29 {strides = array<i32>} : memref<1x128xf32, #tpu.memory_space<vmem>>, vector<1x128xf32>,
    return
  }
}

</mosaic_0001>

<bundles_post_ra>
// kernel: tpu_custom_call.1
= control target key start
LH: loop header
LB: loop body
LE: loop exit
PB: predicated region body
PF: predicated region fallthrough
CT: control target
= control target key end

     0   :  { %11 = vsyncpa [#allocation3], 0  ;;  %s2681_s0 = inlined_call_operand.hbm [shape: f32[8,100], index: 0, kind: input, shape index: {}]   ;;  %s2682_s1 = inlined_call_operand.hbm [shape: f32[8,100], index: 1, kind: input, shape index: {}]   ;;  %s2683_s2 = inlined_call_operand.hbm [shape: f32[100,2048], index: 2, kind: input, shape index: {}]   ;;  %s2684_s3 = inlined_call_operand.hbm [shape: f32[1024,512], index: 3, kind: input, shape index: {}]   ;;  %s2685_s4 = inlined_call_operand.hbm [shape: f32[256,128], index: 4, kind: input, shape index: {}]   ;;  %s2686_s5 = inlined_call_operand.hbm [shape: f32[1,1664], index: 5, kind: input, shape index: {}]   ;;  %s2687_s6 = inlined_call_operand.hbm [shape: f32[1,128], index: 6, kind: output, shape index: {}]  }
   0x1   :  { %12 = vsyncpa [#allocation6], 0 }
   0x2   :  { %13 = vsyncpa [#allocation9], 0 }
   0x3   :  { %14 = vsyncpa [#allocation12], 0 }
   0x4   :  { %15 = vsyncpa [#allocation4], 0  ;;  %s2458_s21 = smov [#allocation5]   ;;  %s2459_s23 = smov [#allocation8]  }
   0x5   :  { %s32_s22 = sshll.u32 %s2458_s21, 4  ;;  %s53_s24 = sshll.u32 %s2459_s23, 4  ;;  %s33_s22 = int_to_ptr.vmem [resolvable:$true] %s32_s22  ;;  %s54_s24 = int_to_ptr.vmem [resolvable:$true] %s53_s24 }
   0x6   :  { %s2316_s25 = scalar_lea.vmem %s33_s22, 128  ;;  %p2321_p1 = scmp.lt.s32.totalorder %s33_s22, %s33_s22 }
   0x7   :  { %p2317_p0 = scmp.ne.s32.totalorder %s33_s22, %s2316_s25  ;;  %p2322_p2 = scmp.lt.s32.totalorder %s2316_s25, %s2316_s25 }
   0x9   :  { %p2323_p3 = por %p2322_p2, %p2321_p1 }
   0xb   :  { %p2324_p4 = pnand %p2323_p3, %p2317_p0 }
   0xd   :  { %2327 = shalt.err (!%p2324_p4)
}
   0xe   :  { %35 = dma.hbm_to_vmem [thread:$0]  %s2682_s1, 128, %s33_s22, [#allocation6]  }
   0xf   :  { %s2336_s28 = scalar_lea.vmem %s54_s24, 65536  ;;  %p2341_p6 = scmp.lt.s32.totalorder %s54_s24, %s54_s24 }
  0x10   :  { %p2337_p5 = scmp.ne.s32.totalorder %s54_s24, %s2336_s28  ;;  %p2342_p7 = scmp.lt.s32.totalorder %s2336_s28, %s2336_s28 }
  0x12   :  { %p2343_p8 = por %p2342_p7, %p2341_p6 }
  0x14   :  { %p2344_p9 = pnand %p2343_p8, %p2337_p5 }
  0x16   :  { %2347 = shalt.err (!%p2344_p9)
}
  0x17   :  { %s2460_s29 = smov 512   ;;  %s2461_s30 = smov 32  }
  0x18   :  { %59 = dma.hbm_to_vmem [thread:$0]  %s2684_s3, 65536, %s54_s24, [#allocation9], %s2460_s29, %s2460_s29, %s2461_s30  }
  0x19   :  { %s2462_s9 = smov [#allocation2]   ;;  %s2463_s11 = smov [#allocation7]  }
  0x1a   :  { %s22_s10 = sshll.u32 %s2462_s9, 4  ;;  %s41_s12 = sshll.u32 %s2463_s11, 4  ;;  %s23_s10 = int_to_ptr.vmem [resolvable:$true] %s22_s10  ;;  %s42_s12 = int_to_ptr.vmem [resolvable:$true] %s41_s12 }
  0x1b   :  { %s2356_s1 = scalar_lea.vmem %s23_s10, 128  ;;  %p2361_p11 = scmp.lt.s32.totalorder %s23_s10, %s23_s10 }
  0x1c   :  { %p2357_p10 = scmp.ne.s32.totalorder %s23_s10, %s2356_s1  ;;  %p2362_p12 = scmp.lt.s32.totalorder %s2356_s1, %s2356_s1 }
  0x1e   :  { %p2363_p13 = por %p2362_p12, %p2361_p11 }
  0x20   :  { %p2364_p0 = pnand %p2363_p13, %p2357_p10 }
  0x22   :  { %2367 = shalt.err (!%p2364_p0)
}
  0x23   :  { %25 = dma.hbm_to_vmem [thread:$0]  %s2681_s0, 128, %s23_s10, [#allocation3]  }
  0x24   :  { %s2376_s15 = scalar_lea.vmem %s42_s12, 26624  ;;  %p2381_p2 = scmp.lt.s32.totalorder %s42_s12, %s42_s12 }
  0x25   :  { %p2377_p1 = scmp.ne.s32.totalorder %s42_s12, %s2376_s15  ;;  %p2382_p3 = scmp.lt.s32.totalorder %s2376_s15, %s2376_s15 }
  0x27   :  { %p2383_p4 = por %p2382_p3, %p2381_p2 }
  0x29   :  { %p2384_p5 = pnand %p2383_p4, %p2377_p1 }
  0x2b   :  { %2387 = shalt.err (!%p2384_p5)
}
  0x2c   :  { %s2464_s3 = smov 2048   ;;  %s2465_s16 = smov 128  }
  0x2d   :  { %47 = dma.hbm_to_vmem [thread:$0]  %s2683_s2, 26624, %s42_s12, [#allocation6], %s2464_s3, %s2464_s3, %s2465_s16  }
  0x2e   :  { %s2466_s19 = smov [#allocation10]   ;;  %s2467_s21 = smov [#allocation11]  }
  0x2f   :  { %s65_s20 = sshll.u32 %s2466_s19, 4  ;;  %s78_s22 = sshll.u32 %s2467_s21, 4  ;;  %s66_s20 = int_to_ptr.vmem [resolvable:$true] %s65_s20  ;;  %s79_s22 = int_to_ptr.vmem [resolvable:$true] %s78_s22 }
  0x30   :  { %s2396_s23 = scalar_lea.vmem %s66_s20, 4096  ;;  %p2401_p7 = scmp.lt.s32.totalorder %s66_s20, %s66_s20 }
  0x31   :  { %p2397_p6 = scmp.ne.s32.totalorder %s66_s20, %s2396_s23  ;;  %p2402_p8 = scmp.lt.s32.totalorder %s2396_s23, %s2396_s23 }
  0x33   :  { %p2403_p9 = por %p2402_p8, %p2401_p7 }
  0x35   :  { %p2404_p10 = pnand %p2403_p9, %p2397_p6 }
  0x37   :  { %2407 = shalt.err (!%p2404_p10)
}
  0x38   :  { %s2468_s0 = smov 8   ;;  %s2416_s26 = scalar_lea.vmem %s79_s22, 208 }
  0x39   :  { %71 = dma.hbm_to_vmem [thread:$0]  %s2685_s4, 4096, %s66_s20, [#allocation9], %s2465_s16, %s2465_s16, %s2468_s0  }
  0x3a   :  { %p2417_p11 = scmp.ne.s32.totalorder %s79_s22, %s2416_s26  ;;  %s2420_s2 = scalar_lea.vmem %s79_s22, 224 }
  0x3b   :  { %p2421_p12 = scmp.lt.s32.totalorder %s79_s22, %s79_s22  ;;  %p2422_p13 = scmp.lt.s32.totalorder %s2420_s2, %s2416_s26 }
  0x3d   :  { %p2423_p0 = por %p2422_p13, %p2421_p12 }
  0x3f   :  { %p2424_p1 = pnand %p2423_p0, %p2417_p11 }
  0x41   :  { %2427 = shalt.err (!%p2424_p1)
}
  0x42   :  { %81 = dma.hbm_to_vmem [thread:$0]  %s2686_s5, 208, %s79_s22, [#allocation12]  }
  0x43   :  { %2448 = dma.done.wait [#allocation3], 128  }
  0x44   :  { %2449 = vsyncadd [#allocation3], 4294967168 }
  0x45   :  { %2450 = dma.done.wait [#allocation6], 26752  }
  0x46   :  { %2451 = vsyncadd [#allocation6], 4294940544 }
  0x47   :  { %2452 = dma.done.wait [#allocation9], 69632  }
  0x48   :  { %2453 = vsyncadd [#allocation9], 4294897664 }
  0x49   :  { %2454 = dma.done.wait [#allocation12], 208  }
  0x4a   :  { %2455 = vsyncadd [#allocation12], 4294967088  ;;  %v2469_v0 = vmov 0.0   ;;  %vm314_vm0 = vcmask 1043456   ;;  %v303_v1 = vld [vmem:[#allocation7 + $0x648] sm:$0xf] }
  0x4b   :  { %403 = vmatprep.mubr.f32.mxu1 %v2469_v0  ;;  %545 = vmatprep.mubr.f32.mxu0 %v2469_v0  ;;  %v307_v2 = vld [vmem:[#allocation7 + $0x668] sm:$0xf]  ;;  %v302_v3 = vld [vmem:[#allocation7 + $0x640] sm:$0xf]  ;;  %v2530_v53 = vld [vmem:[#allocation5] sm:$0xff]  ;;  %vm310_vm1 = vcmask 818176  }
  0x4c   :  { %2236 = vmatprep.subr.msk.mxu1 %vm314_vm0, %v303_v1  ;;  %2242 = vmatprep.subr.msk.mxu0 %vm314_vm0, %v307_v2  ;;  %v306_v4 = vld [vmem:[#allocation7 + $0x660] sm:$0xf]  ;;  %v295_v5 = vld [vmem:[#allocation7 + $0x5c8] sm:$0xff]  ;;  %v305_v54 = vld [vmem:[#allocation7 + $0x658] sm:$0xf]  ;;  %s2470_s4 = smov [#allocation13]  }
  0x4d   :  { %v299_v6 = vld [vmem:[#allocation7 + $0x5e8] sm:$0xff]  ;;  %2237 = vmatpush1.msk.msra.mxu1 %vm314_vm0, %v302_v3  ;;  %2243 = vmatpush1.msk.msra.mxu0 %vm314_vm0, %v306_v4  ;;  %v294_v7 = vld [vmem:[#allocation7 + $0x5c0] sm:$0xff]  ;;  %v304_v56 = vld [vmem:[#allocation7 + $0x650] sm:$0xf]  ;;  %s2224_s5 = sshll.u32 %s2470_s4, 4  ;;  %s2225_s5 = int_to_ptr.vmem [resolvable:$true] %s2224_s5 }
  0x4e   :  { %v298_v8 = vld [vmem:[#allocation7 + $0x5e0] sm:$0xff]  ;;  %v287_v9 = vld [vmem:[#allocation7 + $0x548] sm:$0xff]  ;;  %347 = vmatprep.subr.mxu1 %v295_v5  ;;  %489 = vmatprep.subr.mxu0 %v299_v6  ;;  %v297_v57 = vld [vmem:[#allocation7 + $0x5d8] sm:$0xff]  ;;  %s2428_s29 = scalar_lea.vmem %s2225_s5, 16  ;;  %s2432_s30 = scalar_lea.vmem %s2225_s5, 32 }
  0x4f   :  { %v291_v10 = vld [vmem:[#allocation7 + $0x568] sm:$0xff]  ;;  %v286_v11 = vld [vmem:[#allocation7 + $0x540] sm:$0xff]  ;;  %348 = vmatpush1.msra.mxu1 %v294_v7  ;;  %490 = vmatpush1.msra.mxu0 %v298_v8  ;;  %v296_v59 = vld [vmem:[#allocation7 + $0x5d0] sm:$0xff]  ;;  %p2429_p2 = scmp.ne.s32.totalorder %s2225_s5, %s2428_s29  ;;  %p2433_p3 = scmp.lt.s32.totalorder %s2225_s5, %s2225_s5 }
  0x50   :  { %v290_v12 = vld [vmem:[#allocation7 + $0x560] sm:$0xff]  ;;  %v279_v13 = vld [vmem:[#allocation7 + $0x4c8] sm:$0xff]  ;;  %349 = vmatprep.subr.mxu1 %v287_v9  ;;  %491 = vmatprep.subr.mxu0 %v291_v10  ;;  %v289_v61 = vld [vmem:[#allocation7 + $0x558] sm:$0xff]  ;;  %p2434_p4 = scmp.lt.s32.totalorder %s2432_s30, %s2428_s29 }
  0x51   :  { %v283_v14 = vld [vmem:[#allocation7 + $0x4e8] sm:$0xff]  ;;  %v278_v15 = vld [vmem:[#allocation7 + $0x4c0] sm:$0xff]  ;;  %350 = vmatpush1.msra.mxu1 %v286_v11  ;;  %492 = vmatpush1.msra.mxu0 %v290_v12  ;;  %v288_v63 = vld [vmem:[#allocation7 + $0x550] sm:$0xff] }
  0x52   :  { %v282_v16 = vld [vmem:[#allocation7 + $0x4e0] sm:$0xff]  ;;  %v271_v17 = vld [vmem:[#allocation7 + $0x448] sm:$0xff]  ;;  %351 = vmatprep.subr.mxu1 %v279_v13  ;;  %493 = vmatprep.subr.mxu0 %v283_v14  ;;  %v281_v2 = vld [vmem:[#allocation7 + $0x4d8] sm:$0xff]  ;;  %p2435_p5 = por %p2434_p4, %p2433_p3 }
  0x53   :  { %v275_v18 = vld [vmem:[#allocation7 + $0x468] sm:$0xff]  ;;  %v270_v19 = vld [vmem:[#allocation7 + $0x440] sm:$0xff]  ;;  %352 = vmatpush1.msra.mxu1 %v278_v15  ;;  %494 = vmatpush1.msra.mxu0 %v282_v16  ;;  %v280_v4 = vld [vmem:[#allocation7 + $0x4d0] sm:$0xff] }
  0x54   :  { %v274_v20 = vld [vmem:[#allocation7 + $0x460] sm:$0xff]  ;;  %v263_v21 = vld [vmem:[#allocation7 + $0x3c8] sm:$0xff]  ;;  %353 = vmatprep.subr.mxu1 %v271_v17  ;;  %495 = vmatprep.subr.mxu0 %v275_v18  ;;  %v273_v6 = vld [vmem:[#allocation7 + $0x458] sm:$0xff]  ;;  %p2436_p6 = pnand %p2435_p5, %p2429_p2 }
  0x55   :  { %v267_v22 = vld [vmem:[#allocation7 + $0x3e8] sm:$0xff]  ;;  %v262_v23 = vld [vmem:[#allocation7 + $0x3c0] sm:$0xff]  ;;  %354 = vmatpush1.msra.mxu1 %v270_v19  ;;  %496 = vmatpush1.msra.mxu0 %v274_v20  ;;  %v272_v8 = vld [vmem:[#allocation7 + $0x450] sm:$0xff] }
  0x56   :  { %v266_v24 = vld [vmem:[#allocation7 + $0x3e0] sm:$0xff]  ;;  %v255_v25 = vld [vmem:[#allocation7 + $0x348] sm:$0xff]  ;;  %355 = vmatprep.subr.mxu1 %v263_v21  ;;  %497 = vmatprep.subr.mxu0 %v267_v22  ;;  %v265_v10 = vld [vmem:[#allocation7 + $0x3d8] sm:$0xff] }
  0x57   :  { %v259_v26 = vld [vmem:[#allocation7 + $0x368] sm:$0xff]  ;;  %v254_v27 = vld [vmem:[#allocation7 + $0x340] sm:$0xff]  ;;  %356 = vmatpush1.msra.mxu1 %v262_v23  ;;  %498 = vmatpush1.msra.mxu0 %v266_v24  ;;  %v264_v12 = vld [vmem:[#allocation7 + $0x3d0] sm:$0xff] }
  0x58   :  { %v258_v28 = vld [vmem:[#allocation7 + $0x360] sm:$0xff]  ;;  %v247_v29 = vld [vmem:[#allocation7 + $0x2c8] sm:$0xff]  ;;  %357 = vmatprep.subr.mxu1 %v255_v25  ;;  %499 = vmatprep.subr.mxu0 %v259_v26  ;;  %v257_v14 = vld [vmem:[#allocation7 + $0x358] sm:$0xff] }
  0x59   :  { %v251_v30 = vld [vmem:[#allocation7 + $0x2e8] sm:$0xff]  ;;  %v246_v31 = vld [vmem:[#allocation7 + $0x2c0] sm:$0xff]  ;;  %358 = vmatpush1.msra.mxu1 %v254_v27  ;;  %500 = vmatpush1.msra.mxu0 %v258_v28  ;;  %v256_v16 = vld [vmem:[#allocation7 + $0x350] sm:$0xff] }
  0x5a   :  { %v250_v32 = vld [vmem:[#allocation7 + $0x2e0] sm:$0xff]  ;;  %v239_v33 = vld [vmem:[#allocation7 + $0x248] sm:$0xff]  ;;  %359 = vmatprep.subr.mxu1 %v247_v29  ;;  %501 = vmatprep.subr.mxu0 %v251_v30  ;;  %v249_v18 = vld [vmem:[#allocation7 + $0x2d8] sm:$0xff] }
  0x5b   :  { %v243_v34 = vld [vmem:[#allocation7 + $0x268] sm:$0xff]  ;;  %v238_v35 = vld [vmem:[#allocation7 + $0x240] sm:$0xff]  ;;  %360 = vmatpush1.msra.mxu1 %v246_v31  ;;  %502 = vmatpush1.msra.mxu0 %v250_v32  ;;  %v248_v20 = vld [vmem:[#allocation7 + $0x2d0] sm:$0xff] }
  0x5c   :  { %v242_v36 = vld [vmem:[#allocation7 + $0x260] sm:$0xff]  ;;  %v231_v37 = vld [vmem:[#allocation7 + $0x1c8] sm:$0xff]  ;;  %361 = vmatprep.subr.mxu1 %v239_v33  ;;  %503 = vmatprep.subr.mxu0 %v243_v34  ;;  %v241_v22 = vld [vmem:[#allocation7 + $0x258] sm:$0xff] }
  0x5d   :  { %v235_v38 = vld [vmem:[#allocation7 + $0x1e8] sm:$0xff]  ;;  %v230_v39 = vld [vmem:[#allocation7 + $0x1c0] sm:$0xff]  ;;  %362 = vmatpush1.msra.mxu1 %v238_v35  ;;  %504 = vmatpush1.msra.mxu0 %v242_v36  ;;  %v240_v24 = vld [vmem:[#allocation7 + $0x250] sm:$0xff] }
  0x5e   :  { %v234_v40 = vld [vmem:[#allocation7 + $0x1e0] sm:$0xff]  ;;  %v223_v41 = vld [vmem:[#allocation7 + $0x148] sm:$0xff]  ;;  %363 = vmatprep.subr.mxu1 %v231_v37  ;;  %505 = vmatprep.subr.mxu0 %v235_v38  ;;  %v233_v26 = vld [vmem:[#allocation7 + $0x1d8] sm:$0xff] }
  0x5f   :  { %v227_v42 = vld [vmem:[#allocation7 + $0x168] sm:$0xff]  ;;  %v222_v43 = vld [vmem:[#allocation7 + $0x140] sm:$0xff]  ;;  %364 = vmatpush1.msra.mxu1 %v230_v39  ;;  %506 = vmatpush1.msra.mxu0 %v234_v40  ;;  %v232_v28 = vld [vmem:[#allocation7 + $0x1d0] sm:$0xff] }
  0x60   :  { %v226_v44 = vld [vmem:[#allocation7 + $0x160] sm:$0xff]  ;;  %v215_v45 = vld [vmem:[#allocation7 + $0xc8] sm:$0xff]  ;;  %365 = vmatprep.subr.mxu1 %v223_v41  ;;  %507 = vmatprep.subr.mxu0 %v227_v42  ;;  %v225_v30 = vld [vmem:[#allocation7 + $0x158] sm:$0xff] }
  0x61   :  { %v219_v46 = vld [vmem:[#allocation7 + $0xe8] sm:$0xff]  ;;  %v214_v47 = vld [vmem:[#allocation7 + $0xc0] sm:$0xff]  ;;  %366 = vmatpush1.msra.mxu1 %v222_v43  ;;  %508 = vmatpush1.msra.mxu0 %v226_v44  ;;  %v224_v32 = vld [vmem:[#allocation7 + $0x150] sm:$0xff] }
  0x62   :  { %v218_v48 = vld [vmem:[#allocation7 + $0xe0] sm:$0xff]  ;;  %v207_v49 = vld [vmem:[#allocation7 + $0x48] sm:$0xff]  ;;  %367 = vmatprep.subr.mxu1 %v215_v45  ;;  %509 = vmatprep.subr.mxu0 %v219_v46  ;;  %v217_v34 = vld [vmem:[#allocation7 + $0xd8] sm:$0xff] }
  0x63   :  { %v211_v50 = vld [vmem:[#allocation7 + $0x68] sm:$0xff]  ;;  %v206_v51 = vld [vmem:[#allocation7 + $0x40] sm:$0xff]  ;;  %368 = vmatpush1.msra.mxu1 %v214_v47  ;;  %510 = vmatpush1.msra.mxu0 %v218_v48  ;;  %v216_v36 = vld [vmem:[#allocation7 + $0xd0] sm:$0xff] }
  0x64   :  { %v210_v52 = vld [vmem:[#allocation7 + $0x60] sm:$0xff]  ;;  %369 = vmatprep.subr.mxu1 %v207_v49  ;;  %511 = vmatprep.subr.mxu0 %v211_v50  ;;  %v198_v55 = vld [vmem:[#allocation7 + $0x608] sm:$0xf]  ;;  %v209_v38 = vld [vmem:[#allocation7 + $0x58] sm:$0xff] }
  0x65   :  { %370 = vmatpush1.msra.mxu1 %v206_v51  ;;  %512 = vmatpush1.msra.mxu0 %v210_v52  ;;  %v197_v58 = vld [vmem:[#allocation7 + $0x600] sm:$0xf]  ;;  %v190_v60 = vld [vmem:[#allocation7 + $0x588] sm:$0xff]  ;;  %v208_v40 = vld [vmem:[#allocation7 + $0x50] sm:$0xff] }
  0x66   :  { %2238 = vmatmul.mubr.msk.f32.vlgmr.msra.gmra.mxu1 %vm310_vm1, %v2530_v53  ;;  %2239 = vmatprep.subr.msk.mxu1 %vm314_vm0, %v305_v54  ;;  %v189_v62 = vld [vmem:[#allocation7 + $0x580] sm:$0xff]  ;;  %v182_v1 = vld [vmem:[#allocation7 + $0x508] sm:$0xff]  ;;  %v309_v43 = vld [vmem:[#allocation7 + $0x678] sm:$0xf] }
  0x67   :  { %2248 = vmatprep.subr.msk.mxu0 %vm314_vm0, %v198_v55  ;;  %2240 = vmatpush1.msk.msra.mxu1 %vm314_vm0, %v304_v56  ;;  %v181_v3 = vld [vmem:[#allocation7 + $0x500] sm:$0xff]  ;;  %v174_v5 = vld [vmem:[#allocation7 + $0x488] sm:$0xff]  ;;  %v2541_v44 = vld [vmem:[#allocation2] sm:$0xff] }
  0x68   :  { %2244 = vmatmul.mubr.msk.f32.vlgmr.msra.gmra.mxu0 %vm310_vm1, %v2530_v53  ;;  %418 = vmatprep.subr.mxu1 %v297_v57  ;;  %v173_v7 = vld [vmem:[#allocation7 + $0x480] sm:$0xff]  ;;  %v166_v9 = vld [vmem:[#allocation7 + $0x408] sm:$0xff]  ;;  %v308_v46 = vld [vmem:[#allocation7 + $0x670] sm:$0xf] }
  0x69   :  { %2249 = vmatpush1.msk.msra.mxu0 %vm314_vm0, %v197_v58  ;;  %419 = vmatpush1.msra.mxu1 %v296_v59  ;;  %v165_v11 = vld [vmem:[#allocation7 + $0x400] sm:$0xff]  ;;  %v158_v13 = vld [vmem:[#allocation7 + $0x388] sm:$0xff]  ;;  %v301_v48 = vld [vmem:[#allocation7 + $0x5f8] sm:$0xff] }
  0x6a   :  { %658 = vmatprep.subr.mxu0 %v190_v60  ;;  %420 = vmatprep.subr.mxu1 %v289_v61  ;;  %v157_v15 = vld [vmem:[#allocation7 + $0x380] sm:$0xff]  ;;  %v150_v17 = vld [vmem:[#allocation7 + $0x308] sm:$0xff]  ;;  %v300_v50 = vld [vmem:[#allocation7 + $0x5f0] sm:$0xff] }
  0x6b   :  { %659 = vmatpush1.msra.mxu0 %v189_v62  ;;  %421 = vmatpush1.msra.mxu1 %v288_v63  ;;  %v149_v19 = vld [vmem:[#allocation7 + $0x300] sm:$0xff]  ;;  %v142_v21 = vld [vmem:[#allocation7 + $0x288] sm:$0xff]  ;;  %v293_v52 = vld [vmem:[#allocation7 + $0x578] sm:$0xff] }
  0x6c   :  { %660 = vmatprep.subr.mxu0 %v182_v1  ;;  %422 = vmatprep.subr.mxu1 %v281_v2  ;;  %v141_v23 = vld [vmem:[#allocation7 + $0x280] sm:$0xff]  ;;  %v134_v25 = vld [vmem:[#allocation7 + $0x208] sm:$0xff]  ;;  %v292_v55 = vld [vmem:[#allocation7 + $0x570] sm:$0xff] }
  0x6d   :  { %661 = vmatpush1.msra.mxu0 %v181_v3  ;;  %423 = vmatpush1.msra.mxu1 %v280_v4  ;;  %v133_v27 = vld [vmem:[#allocation7 + $0x200] sm:$0xff]  ;;  %v126_v29 = vld [vmem:[#allocation7 + $0x188] sm:$0xff]  ;;  %v285_v57 = vld [vmem:[#allocation7 + $0x4f8] sm:$0xff] }
  0x6e   :  { %662 = vmatprep.subr.mxu0 %v174_v5  ;;  %424 = vmatprep.subr.mxu1 %v273_v6  ;;  %v125_v31 = vld [vmem:[#allocation7 + $0x180] sm:$0xff]  ;;  %v118_v33 = vld [vmem:[#allocation7 + $0x108] sm:$0xff]  ;;  %v284_v59 = vld [vmem:[#allocation7 + $0x4f0] sm:$0xff] }
  0x6f   :  { %663 = vmatpush1.msra.mxu0 %v173_v7  ;;  %425 = vmatpush1.msra.mxu1 %v272_v8  ;;  %v117_v35 = vld [vmem:[#allocation7 + $0x100] sm:$0xff]  ;;  %v110_v37 = vld [vmem:[#allocation7 + $0x88] sm:$0xff]  ;;  %v277_v61 = vld [vmem:[#allocation7 + $0x478] sm:$0xff] }
  0x70   :  { %664 = vmatprep.subr.mxu0 %v166_v9  ;;  %426 = vmatprep.subr.mxu1 %v265_v10  ;;  %v109_v39 = vld [vmem:[#allocation7 + $0x80] sm:$0xff]  ;;  %v102_v41 = vld [vmem:[#allocation7 + $0x8] sm:$0xff]  ;;  %v276_v63 = vld [vmem:[#allocation7 + $0x470] sm:$0xff] }
  0x71   :  { %665 = vmatpush1.msra.mxu0 %v165_v11  ;;  %427 = vmatpush1.msra.mxu1 %v264_v12  ;;  %v101_v42 = vld [vmem:[#allocation7] sm:$0xff]  ;;  %v202_v45 = vld [vmem:[#allocation7 + $0x628] sm:$0xf]  ;;  %v269_v2 = vld [vmem:[#allocation7 + $0x3f8] sm:$0xff] }
  0x72   :  { %666 = vmatprep.subr.mxu0 %v158_v13  ;;  %428 = vmatprep.subr.mxu1 %v257_v14  ;;  %v201_v47 = vld [vmem:[#allocation7 + $0x620] sm:$0xf]  ;;  %v194_v49 = vld [vmem:[#allocation7 + $0x5a8] sm:$0xff]  ;;  %v268_v4 = vld [vmem:[#allocation7 + $0x3f0] sm:$0xff] }
  0x73   :  { %667 = vmatpush1.msra.mxu0 %v157_v15  ;;  %429 = vmatpush1.msra.mxu1 %v256_v16  ;;  %v193_v51 = vld [vmem:[#allocation7 + $0x5a0] sm:$0xff]  ;;  %v186_v54 = vld [vmem:[#allocation7 + $0x528] sm:$0xff]  ;;  %v261_v6 = vld [vmem:[#allocation7 + $0x378] sm:$0xff] }
  0x74   :  { %668 = vmatprep.subr.mxu0 %v150_v17  ;;  %430 = vmatprep.subr.mxu1 %v249_v18  ;;  %v185_v56 = vld [vmem:[#allocation7 + $0x520] sm:$0xff]  ;;  %v178_v58 = vld [vmem:[#allocation7 + $0x4a8] sm:$0xff]  ;;  %v260_v8 = vld [vmem:[#allocation7 + $0x370] sm:$0xff] }
  0x75   :  { %669 = vmatpush1.msra.mxu0 %v149_v19  ;;  %431 = vmatpush1.msra.mxu1 %v248_v20  ;;  %v177_v60 = vld [vmem:[#allocation7 + $0x4a0] sm:$0xff]  ;;  %v170_v62 = vld [vmem:[#allocation7 + $0x428] sm:$0xff]  ;;  %v253_v10 = vld [vmem:[#allocation7 + $0x2f8] sm:$0xff] }
  0x76   :  { %670 = vmatprep.subr.mxu0 %v142_v21  ;;  %432 = vmatprep.subr.mxu1 %v241_v22  ;;  %v169_v1 = vld [vmem:[#allocation7 + $0x420] sm:$0xff]  ;;  %v162_v3 = vld [vmem:[#allocation7 + $0x3a8] sm:$0xff]  ;;  %v252_v12 = vld [vmem:[#allocation7 + $0x2f0] sm:$0xff] }
  0x77   :  { %671 = vmatpush1.msra.mxu0 %v141_v23  ;;  %433 = vmatpush1.msra.mxu1 %v240_v24  ;;  %v161_v5 = vld [vmem:[#allocation7 + $0x3a0] sm:$0xff]  ;;  %v154_v7 = vld [vmem:[#allocation7 + $0x328] sm:$0xff]  ;;  %v245_v14 = vld [vmem:[#allocation7 + $0x278] sm:$0xff] }
  0x78   :  { %672 = vmatprep.subr.mxu0 %v134_v25  ;;  %434 = vmatprep.subr.mxu1 %v233_v26  ;;  %v153_v9 = vld [vmem:[#allocation7 + $0x320] sm:$0xff]  ;;  %v146_v11 = vld [vmem:[#allocation7 + $0x2a8] sm:$0xff]  ;;  %v244_v16 = vld [vmem:[#allocation7 + $0x270] sm:$0xff] }
  0x79   :  { %673 = vmatpush1.msra.mxu0 %v133_v27  ;;  %435 = vmatpush1.msra.mxu1 %v232_v28  ;;  %v145_v13 = vld [vmem:[#allocation7 + $0x2a0] sm:$0xff]  ;;  %v138_v15 = vld [vmem:[#allocation7 + $0x228] sm:$0xff]  ;;  %v237_v18 = vld [vmem:[#allocation7 + $0x1f8] sm:$0xff] }
  0x7a   :  { %674 = vmatprep.subr.mxu0 %v126_v29  ;;  %436 = vmatprep.subr.mxu1 %v225_v30  ;;  %v137_v17 = vld [vmem:[#allocation7 + $0x220] sm:$0xff]  ;;  %v130_v19 = vld [vmem:[#allocation7 + $0x1a8] sm:$0xff]  ;;  %v236_v20 = vld [vmem:[#allocation7 + $0x1f0] sm:$0xff] }
  0x7b   :  { %675 = vmatpush1.msra.mxu0 %v125_v31  ;;  %437 = vmatpush1.msra.mxu1 %v224_v32  ;;  %v129_v21 = vld [vmem:[#allocation7 + $0x1a0] sm:$0xff]  ;;  %v229_v22 = vld [vmem:[#allocation7 + $0x178] sm:$0xff]  ;;  %v122_v23 = vld [vmem:[#allocation7 + $0x128] sm:$0xff] }
  0x7c   :  { %676 = vmatprep.subr.mxu0 %v118_v33  ;;  %438 = vmatprep.subr.mxu1 %v217_v34  ;;  %v228_v24 = vld [vmem:[#allocation7 + $0x170] sm:$0xff]  ;;  %v121_v25 = vld [vmem:[#allocation7 + $0x120] sm:$0xff]  ;;  %v221_v26 = vld [vmem:[#allocation7 + $0xf8] sm:$0xff] }
  0x7d   :  { %677 = vmatpush1.msra.mxu0 %v117_v35  ;;  %439 = vmatpush1.msra.mxu1 %v216_v36  ;;  %v114_v27 = vld [vmem:[#allocation7 + $0xa8] sm:$0xff]  ;;  %v220_v28 = vld [vmem:[#allocation7 + $0xf0] sm:$0xff]  ;;  %v113_v29 = vld [vmem:[#allocation7 + $0xa0] sm:$0xff] }
  0x7e   :  { %678 = vmatprep.subr.mxu0 %v110_v37  ;;  %440 = vmatprep.subr.mxu1 %v209_v38  ;;  %v213_v30 = vld [vmem:[#allocation7 + $0x78] sm:$0xff]  ;;  %v106_v31 = vld [vmem:[#allocation7 + $0x28] sm:$0xff]  ;;  %v212_v32 = vld [vmem:[#allocation7 + $0x70] sm:$0xff] }
  0x7f   :  { %679 = vmatpush1.msra.mxu0 %v109_v39  ;;  %441 = vmatpush1.msra.mxu1 %v208_v40  ;;  %v105_v33 = vld [vmem:[#allocation7 + $0x20] sm:$0xff]  ;;  %v200_v34 = vld [vmem:[#allocation7 + $0x618] sm:$0xf]  ;;  %v199_v35 = vld [vmem:[#allocation7 + $0x610] sm:$0xf] }
  0x80   :  { %680 = vmatprep.subr.mxu0 %v102_v41  ;;  %474 = vmatprep.mubr.f32.mxu1 %v2469_v0  ;;  %v192_v36 = vld [vmem:[#allocation7 + $0x598] sm:$0xff]  ;;  %v191_v37 = vld [vmem:[#allocation7 + $0x590] sm:$0xff]  ;;  %v1053_v38 = vld [vmem:[#allocation8 + $0x1e8] sm:$0xff] }
  0x81   :  { %681 = vmatpush1.msra.mxu0 %v101_v42  ;;  %714 = vmatprep.mubr.f32.mxu0 %v2469_v0  ;;  %v184_v39 = vld [vmem:[#allocation7 + $0x518] sm:$0xff]  ;;  %v1052_v40 = vld [vmem:[#allocation8 + $0x1e0] sm:$0xff]  ;;  %v183_v41 = vld [vmem:[#allocation7 + $0x510] sm:$0xff] }
  0x82   :  { %2241 = vmatmul.mubr.msk.f32.vlgmr.msra.gmra.mxu1 %vm310_vm1, %v2530_v53  ;;  %2245 = vmatprep.subr.msk.mxu1 %vm314_vm0, %v309_v43  ;;  %v1049_v42 = vld [vmem:[#allocation8 + $0x1c8] sm:$0xff]  ;;  %v176_v43 = vld [vmem:[#allocation7 + $0x498] sm:$0xff] }
  0x83   :  { %2250 = vmatmul.mubr.msk.f32.vlgmr.msra.gmra.mxu0 %vm310_vm1, %v2541_v44  ;;  %2254 = vmatprep.subr.msk.mxu0 %vm314_vm0, %v202_v45  ;;  %v175_v45 = vld [vmem:[#allocation7 + $0x490] sm:$0xff] }
  0x84   :  { %2246 = vmatpush1.msk.msra.mxu1 %vm314_vm0, %v308_v46  ;;  %2255 = vmatpush1.msk.msra.mxu0 %vm314_vm0, %v201_v47  ;;  %v1045_v46 = vld [vmem:[#allocation8 + $0x1a8] sm:$0xff]  ;;  %v168_v47 = vld [vmem:[#allocation7 + $0x418] sm:$0xff] }
  0x85   :  { %560 = vmatprep.subr.mxu1 %v301_v48  ;;  %800 = vmatprep.subr.mxu0 %v194_v49  ;;  %v1044_v48 = vld [vmem:[#allocation8 + $0x1a0] sm:$0xff]  ;;  %v167_v49 = vld [vmem:[#allocation7 + $0x410] sm:$0xff] }
  0x86   :  { %561 = vmatpush1.msra.mxu1 %v300_v50  ;;  %801 = vmatpush1.msra.mxu0 %v193_v51  ;;  %v1041_v50 = vld [vmem:[#allocation8 + $0x188] sm:$0xff]  ;;  %v160_v51 = vld [vmem:[#allocation7 + $0x398] sm:$0xff] }
  0x87   :  { %562 = vmatprep.subr.mxu1 %v293_v52  ;;  %802 = vmatprep.subr.mxu0 %v186_v54  ;;  %v1040_v52 = vld [vmem:[#allocation8 + $0x180] sm:$0xff]  ;;  %v159_v54 = vld [vmem:[#allocation7 + $0x390] sm:$0xff] }
  0x88   :  { %563 = vmatpush1.msra.mxu1 %v292_v55  ;;  %803 = vmatpush1.msra.mxu0 %v185_v56  ;;  %v1037_v55 = vld [vmem:[#allocation8 + $0x168] sm:$0xff]  ;;  %v152_v56 = vld [vmem:[#allocation7 + $0x318] sm:$0xff] }
  0x89   :  { %564 = vmatprep.subr.mxu1 %v285_v57  ;;  %804 = vmatprep.subr.mxu0 %v178_v58  ;;  %v1036_v57 = vld [vmem:[#allocation8 + $0x160] sm:$0xff]  ;;  %v151_v58 = vld [vmem:[#allocation7 + $0x310] sm:$0xff] }
  0x8a   :  { %565 = vmatpush1.msra.mxu1 %v284_v59  ;;  %805 = vmatpush1.msra.mxu0 %v177_v60  ;;  %v1033_v59 = vld [vmem:[#allocation8 + $0x148] sm:$0xff]  ;;  %v144_v60 = vld [vmem:[#allocation7 + $0x298] sm:$0xff] }
  0x8b   :  { %566 = vmatprep.subr.mxu1 %v277_v61  ;;  %806 = vmatprep.subr.mxu0 %v170_v62  ;;  %v1032_v61 = vld [vmem:[#allocation8 + $0x140] sm:$0xff]  ;;  %v143_v62 = vld [vmem:[#allocation7 + $0x290] sm:$0xff] }
  0x8c   :  { %567 = vmatpush1.msra.mxu1 %v276_v63  ;;  %807 = vmatpush1.msra.mxu0 %v169_v1  ;;  %v1029_v63 = vld [vmem:[#allocation8 + $0x128] sm:$0xff]  ;;  %v136_v1 = vld [vmem:[#allocation7 + $0x218] sm:$0xff] }
  0x8d   :  { %568 = vmatprep.subr.mxu1 %v269_v2  ;;  %808 = vmatprep.subr.mxu0 %v162_v3  ;;  %v1028_v2 = vld [vmem:[#allocation8 + $0x120] sm:$0xff]  ;;  %v135_v3 = vld [vmem:[#allocation7 + $0x210] sm:$0xff] }
  0x8e   :  { %569 = vmatpush1.msra.mxu1 %v268_v4  ;;  %809 = vmatpush1.msra.mxu0 %v161_v5  ;;  %v1025_v4 = vld [vmem:[#allocation8 + $0x108] sm:$0xff]  ;;  %v128_v5 = vld [vmem:[#allocation7 + $0x198] sm:$0xff] }
  0x8f   :  { %570 = vmatprep.subr.mxu1 %v261_v6  ;;  %810 = vmatprep.subr.mxu0 %v154_v7  ;;  %v1024_v6 = vld [vmem:[#allocation8 + $0x100] sm:$0xff]  ;;  %v127_v7 = vld [vmem:[#allocation7 + $0x190] sm:$0xff] }
  0x90   :  { %571 = vmatpush1.msra.mxu1 %v260_v8  ;;  %811 = vmatpush1.msra.mxu0 %v153_v9  ;;  %v1021_v8 = vld [vmem:[#allocation8 + $0xe8] sm:$0xff]  ;;  %v120_v9 = vld [vmem:[#allocation7 + $0x118] sm:$0xff] }
  0x91   :  { %572 = vmatprep.subr.mxu1 %v253_v10  ;;  %812 = vmatprep.subr.mxu0 %v146_v11  ;;  %v1020_v10 = vld [vmem:[#allocation8 + $0xe0] sm:$0xff]  ;;  %v119_v11 = vld [vmem:[#allocation7 + $0x110] sm:$0xff] }
  0x92   :  { %573 = vmatpush1.msra.mxu1 %v252_v12  ;;  %813 = vmatpush1.msra.mxu0 %v145_v13  ;;  %v1017_v12 = vld [vmem:[#allocation8 + $0xc8] sm:$0xff]  ;;  %v112_v13 = vld [vmem:[#allocation7 + $0x98] sm:$0xff] }
  0x93   :  { %574 = vmatprep.subr.mxu1 %v245_v14  ;;  %814 = vmatprep.subr.mxu0 %v138_v15  ;;  %v1016_v14 = vld [vmem:[#allocation8 + $0xc0] sm:$0xff]  ;;  %v111_v15 = vld [vmem:[#allocation7 + $0x90] sm:$0xff] }
  0x94   :  { %575 = vmatpush1.msra.mxu1 %v244_v16  ;;  %815 = vmatpush1.msra.mxu0 %v137_v17  ;;  %v1013_v16 = vld [vmem:[#allocation8 + $0xa8] sm:$0xff]  ;;  %v104_v17 = vld [vmem:[#allocation7 + $0x18] sm:$0xff] }
  0x95   :  { %576 = vmatprep.subr.mxu1 %v237_v18  ;;  %816 = vmatprep.subr.mxu0 %v130_v19  ;;  %v1012_v18 = vld [vmem:[#allocation8 + $0xa0] sm:$0xff]  ;;  %v103_v19 = vld [vmem:[#allocation7 + $0x10] sm:$0xff] }
  0x96   :  { %577 = vmatpush1.msra.mxu1 %v236_v20  ;;  %817 = vmatpush1.msra.mxu0 %v129_v21  ;;  %v1009_v20 = vld [vmem:[#allocation8 + $0x88] sm:$0xff]  ;;  %v204_v21 = vld [vmem:[#allocation7 + $0x638] sm:$0xf] }
  0x97   :  { %578 = vmatprep.subr.mxu1 %v229_v22  ;;  %818 = vmatprep.subr.mxu0 %v122_v23  ;;  %v203_v22 = vld [vmem:[#allocation7 + $0x630] sm:$0xf]  ;;  %v196_v23 = vld [vmem:[#allocation7 + $0x5b8] sm:$0xff] }
  0x98   :  { %579 = vmatpush1.msra.mxu1 %v228_v24  ;;  %819 = vmatpush1.msra.mxu0 %v121_v25  ;;  %v1008_v24 = vld [vmem:[#allocation8 + $0x80] sm:$0xff]  ;;  %v195_v25 = vld [vmem:[#allocation7 + $0x5b0] sm:$0xff] }
  0x99   :  { %580 = vmatprep.subr.mxu1 %v221_v26  ;;  %820 = vmatprep.subr.mxu0 %v114_v27  ;;  %v1005_v26 = vld [vmem:[#allocation8 + $0x68] sm:$0xff]  ;;  %v188_v27 = vld [vmem:[#allocation7 + $0x538] sm:$0xff] }
  0x9a   :  { %581 = vmatpush1.msra.mxu1 %v220_v28  ;;  %821 = vmatpush1.msra.mxu0 %v113_v29  ;;  %v1004_v28 = vld [vmem:[#allocation8 + $0x60] sm:$0xff]  ;;  %v187_v29 = vld [vmem:[#allocation7 + $0x530] sm:$0xff] }
  0x9b   :  { %582 = vmatprep.subr.mxu1 %v213_v30  ;;  %822 = vmatprep.subr.mxu0 %v106_v31  ;;  %v1001_v30 = vld [vmem:[#allocation8 + $0x48] sm:$0xff]  ;;  %v180_v31 = vld [vmem:[#allocation7 + $0x4b8] sm:$0xff] }
  0x9c   :  { %583 = vmatpush1.msra.mxu1 %v212_v32  ;;  %616 = vmatprep.mubr.f32.mxu1 %v2469_v0  ;;  %v1000_v32 = vld [vmem:[#allocation8 + $0x40] sm:$0xff] }
  0x9d   :  { %823 = vmatpush1.msra.mxu0 %v105_v33  ;;  %856 = vmatprep.mubr.f32.mxu0 %v2469_v0  ;;  %v179_v33 = vld [vmem:[#allocation7 + $0x4b0] sm:$0xff] }
  0x9e   :  { %2247 = vmatmul.mubr.msk.f32.vlgmr.msra.gmra.mxu1 %vm310_vm1, %v2530_v53  ;;  %2251 = vmatprep.subr.msk.mxu1 %vm314_vm0, %v200_v34  ;;  %v1048_v53 = vld [vmem:[#allocation8 + $0x1c0] sm:$0xff]  ;;  %v997_v34 = vld [vmem:[#allocation8 + $0x28] sm:$0xff] }
  0x9f   :  { %2256 = vmatmul.mubr.msk.f32.vlgmr.msra.gmra.mxu0 %vm310_vm1, %v2541_v44  ;;  %2252 = vmatpush1.msk.msra.mxu1 %vm314_vm0, %v199_v35  ;;  %v172_v35 = vld [vmem:[#allocation7 + $0x438] sm:$0xff] }
  0xa0   :  { %729 = vmatprep.subr.mxu1 %v192_v36  ;;  %785 = vmatprep.mubr.f32.mxu1 %v2469_v0  ;;  %v996_v36 = vld [vmem:[#allocation8 + $0x20] sm:$0xff] }
  0xa1   :  { %730 = vmatpush1.msra.mxu1 %v191_v37  ;;  %1526 = vmatprep.subr.mxu0 %v1053_v38  ;;  %v171_v37 = vld [vmem:[#allocation7 + $0x430] sm:$0xff]  ;;  %v164_v38 = vld [vmem:[#allocation7 + $0x3b8] sm:$0xff] }
  0xa2   :  { %731 = vmatprep.subr.mxu1 %v184_v39  ;;  %1527 = vmatpush1.msra.mxu0 %v1052_v40  ;;  %v992_v39 = vld [vmem:[#allocation8] sm:$0xff]  ;;  %v163_v40 = vld [vmem:[#allocation7 + $0x3b0] sm:$0xff] }
  0xa3   :  { %732 = vmatpush1.msra.mxu1 %v183_v41  ;;  %1528 = vmatprep.subr.mxu0 %v1049_v42  ;;  %v1117_v41 = vld [vmem:[#allocation8 + $0x3e8] sm:$0xff]  ;;  %v156_v42 = vld [vmem:[#allocation7 + $0x338] sm:$0xff] }
  0xa4   :  { %733 = vmatprep.subr.mxu1 %v176_v43  ;;  %1529 = vmatpush1.msra.mxu0 %v1048_v53  ;;  %v1116_v43 = vld [vmem:[#allocation8 + $0x3e0] sm:$0xff]  ;;  %v155_v53 = vld [vmem:[#allocation7 + $0x330] sm:$0xff] }
  0xa5   :  { %734 = vmatpush1.msra.mxu1 %v175_v45  ;;  %1530 = vmatprep.subr.mxu0 %v1045_v46  ;;  %v1113_v45 = vld [vmem:[#allocation8 + $0x3c8] sm:$0xff]  ;;  %v148_v46 = vld [vmem:[#allocation7 + $0x2b8] sm:$0xff] }
  0xa6   :  { %735 = vmatprep.subr.mxu1 %v168_v47  ;;  %1531 = vmatpush1.msra.mxu0 %v1044_v48  ;;  %v1112_v47 = vld [vmem:[#allocation8 + $0x3c0] sm:$0xff]  ;;  %v147_v48 = vld [vmem:[#allocation7 + $0x2b0] sm:$0xff] }
  0xa7   :  { %736 = vmatpush1.msra.mxu1 %v167_v49  ;;  %1532 = vmatprep.subr.mxu0 %v1041_v50  ;;  %v1109_v49 = vld [vmem:[#allocation8 + $0x3a8] sm:$0xff]  ;;  %v140_v50 = vld [vmem:[#allocation7 + $0x238] sm:$0xff] }
  0xa8   :  { %737 = vmatprep.subr.mxu1 %v160_v51  ;;  %1533 = vmatpush1.msra.mxu0 %v1040_v52  ;;  %v1108_v51 = vld [vmem:[#allocation8 + $0x3a0] sm:$0xff]  ;;  %v139_v52 = vld [vmem:[#allocation7 + $0x230] sm:$0xff] }
  0xa9   :  { %738 = vmatpush1.msra.mxu1 %v159_v54  ;;  %1534 = vmatprep.subr.mxu0 %v1037_v55  ;;  %v1105_v54 = vld [vmem:[#allocation8 + $0x388] sm:$0xff]  ;;  %v132_v55 = vld [vmem:[#allocation7 + $0x1b8] sm:$0xff] }
  0xaa   :  { %739 = vmatprep.subr.mxu1 %v152_v56  ;;  %1535 = vmatpush1.msra.mxu0 %v1036_v57  ;;  %v1104_v56 = vld [vmem:[#allocation8 + $0x380] sm:$0xff]  ;;  %v131_v57 = vld [vmem:[#allocation7 + $0x1b0] sm:$0xff] }
  0xab   :  { %740 = vmatpush1.msra.mxu1 %v151_v58  ;;  %1536 = vmatprep.subr.mxu0 %v1033_v59  ;;  %v1101_v58 = vld [vmem:[#allocation8 + $0x368] sm:$0xff]  ;;  %v124_v59 = vld [vmem:[#allocation7 + $0x138] sm:$0xff] }
  0xac   :  { %741 = vmatprep.subr.mxu1 %v144_v60  ;;  %1537 = vmatpush1.msra.mxu0 %v1032_v61  ;;  %v1100_v60 = vld [vmem:[#allocation8 + $0x360] sm:$0xff]  ;;  %v123_v61 = vld [vmem:[#allocation7 + $0x130] sm:$0xff] }
  0xad   :  { %742 = vmatpush1.msra.mxu1 %v143_v62  ;;  %1538 = vmatprep.subr.mxu0 %v1029_v63  ;;  %v1097_v62 = vld [vmem:[#allocation8 + $0x348] sm:$0xff]  ;;  %v116_v63 = vld [vmem:[#allocation7 + $0xb8] sm:$0xff] }
  0xae   :  { %743 = vmatprep.subr.mxu1 %v136_v1  ;;  %1539 = vmatpush1.msra.mxu0 %v1028_v2  ;;  %v1096_v1 = vld [vmem:[#allocation8 + $0x340] sm:$0xff]  ;;  %v115_v2 = vld [vmem:[#allocation7 + $0xb0] sm:$0xff] }
  0xaf   :  { %744 = vmatpush1.msra.mxu1 %v135_v3  ;;  %1540 = vmatprep.subr.mxu0 %v1025_v4  ;;  %v1093_v3 = vld [vmem:[#allocation8 + $0x328] sm:$0xff]  ;;  %v108_v4 = vld [vmem:[#allocation7 + $0x38] sm:$0xff] }
  0xb0   :  { %745 = vmatprep.subr.mxu1 %v128_v5  ;;  %1541 = vmatpush1.msra.mxu0 %v1024_v6  ;;  %v1092_v5 = vld [vmem:[#allocation8 + $0x320] sm:$0xff]  ;;  %v107_v6 = vld [vmem:[#allocation7 + $0x30] sm:$0xff] }
  0xb1   :  { %746 = vmatpush1.msra.mxu1 %v127_v7  ;;  %1542 = vmatprep.subr.mxu0 %v1021_v8  ;;  %v1089_v7 = vld [vmem:[#allocation8 + $0x308] sm:$0xff]  ;;  %v1088_v8 = vld [vmem:[#allocation8 + $0x300] sm:$0xff] }
  0xb2   :  { %747 = vmatprep.subr.mxu1 %v120_v9  ;;  %1543 = vmatpush1.msra.mxu0 %v1020_v10  ;;  %v1085_v9 = vld [vmem:[#allocation8 + $0x2e8] sm:$0xff] }
  0xb3   :  { %748 = vmatpush1.msra.mxu1 %v119_v11  ;;  %1544 = vmatprep.subr.mxu0 %v1017_v12  ;;  %v1181_v10 = vld [vmem:[#allocation8 + $0x5e8] sm:$0xff]  ;;  %v1084_v11 = vld [vmem:[#allocation8 + $0x2e0] sm:$0xff] }
  0xb4   :  { %749 = vmatprep.subr.mxu1 %v112_v13  ;;  %1545 = vmatpush1.msra.mxu0 %v1016_v14  ;;  %v1180_v12 = vld [vmem:[#allocation8 + $0x5e0] sm:$0xff]  ;;  %v1081_v13 = vld [vmem:[#allocation8 + $0x2c8] sm:$0xff] }
  0xb5   :  { %750 = vmatpush1.msra.mxu1 %v111_v15  ;;  %1546 = vmatprep.subr.mxu0 %v1013_v16  ;;  %v1177_v14 = vld [vmem:[#allocation8 + $0x5c8] sm:$0xff]  ;;  %v1080_v15 = vld [vmem:[#allocation8 + $0x2c0] sm:$0xff] }
  0xb6   :  { %751 = vmatprep.subr.mxu1 %v104_v17  ;;  %1547 = vmatpush1.msra.mxu0 %v1012_v18  ;;  %v1176_v16 = vld [vmem:[#allocation8 + $0x5c0] sm:$0xff]  ;;  %v1077_v17 = vld [vmem:[#allocation8 + $0x2a8] sm:$0xff] }
  0xb7   :  { %752 = vmatpush1.msra.mxu1 %v103_v19  ;;  %1548 = vmatprep.subr.mxu0 %v1009_v20  ;;  %v1173_v18 = vld [vmem:[#allocation8 + $0x5a8] sm:$0xff]  ;;  %v1076_v19 = vld [vmem:[#allocation8 + $0x2a0] sm:$0xff] }
  0xb8   :  { %2253 = vmatmul.mubr.msk.f32.vlgmr.msra.gmra.mxu1 %vm310_vm1, %v2541_v44  ;;  %2257 = vmatprep.subr.msk.mxu1 %vm314_vm0, %v204_v21  ;;  %v1172_v20 = vld [vmem:[#allocation8 + $0x5a0] sm:$0xff]  ;;  %v1073_v21 = vld [vmem:[#allocation8 + $0x288] sm:$0xff] }
  0xb9   :  { %2258 = vmatpush1.msk.msra.mxu1 %vm314_vm0, %v203_v22  ;;  %927 = vmatprep.mubr.f32.mxu1 %v2469_v0  ;;  %v993_v0 = vld [vmem:[#allocation8 + $0x8] sm:$0xff] }
  0xba   :  { %871 = vmatprep.subr.mxu1 %v196_v23  ;;  %1549 = vmatpush1.msra.mxu0 %v1008_v24  ;;  %v1169_v22 = vld [vmem:[#allocation8 + $0x588] sm:$0xff]  ;;  %v1168_v23 = vld [vmem:[#allocation8 + $0x580] sm:$0xff] }
  0xbb   :  { %872 = vmatpush1.msra.mxu1 %v195_v25  ;;  %1550 = vmatprep.subr.mxu0 %v1005_v26  ;;  %v1069_v24 = vld [vmem:[#allocation8 + $0x268] sm:$0xff]  ;;  %v1068_v26 = vld [vmem:[#allocation8 + $0x260] sm:$0xff] }
  0xbc   :  { %873 = vmatprep.subr.mxu1 %v188_v27  ;;  %1551 = vmatpush1.msra.mxu0 %v1004_v28  ;;  %v1165_v25 = vld [vmem:[#allocation8 + $0x568] sm:$0xff]  ;;  %v1164_v27 = vld [vmem:[#allocation8 + $0x560] sm:$0xff] }
  0xbd   :  { %874 = vmatpush1.msra.mxu1 %v187_v29  ;;  %1552 = vmatprep.subr.mxu0 %v1001_v30  ;;  %v1065_v28 = vld [vmem:[#allocation8 + $0x248] sm:$0xff]  ;;  %v1064_v30 = vld [vmem:[#allocation8 + $0x240] sm:$0xff] }
  0xbe   :  { %875 = vmatprep.subr.mxu1 %v180_v31  ;;  %1553 = vmatpush1.msra.mxu0 %v1000_v32  ;;  %v1161_v29 = vld [vmem:[#allocation8 + $0x548] sm:$0xff]  ;;  %v1160_v31 = vld [vmem:[#allocation8 + $0x540] sm:$0xff] }
  0xbf   :  { %876 = vmatpush1.msra.mxu1 %v179_v33  ;;  %1554 = vmatprep.subr.mxu0 %v997_v34  ;;  %v1061_v32 = vld [vmem:[#allocation8 + $0x228] sm:$0xff]  ;;  %v1060_v34 = vld [vmem:[#allocation8 + $0x220] sm:$0xff] }
  0xc0   :  { %877 = vmatprep.subr.mxu1 %v172_v35  ;;  %1555 = vmatpush1.msra.mxu0 %v996_v36  ;;  %v1157_v33 = vld [vmem:[#allocation8 + $0x528] sm:$0xff]  ;;  %v1156_v35 = vld [vmem:[#allocation8 + $0x520] sm:$0xff] }
  0xc1   :  { %878 = vmatpush1.msra.mxu1 %v171_v37  ;;  %1556 = vmatprep.subr.mxu0 %v993_v0  ;;  %v1057_v36 = vld [vmem:[#allocation8 + $0x208] sm:$0xff]  ;;  %v1056_v0 = vld [vmem:[#allocation8 + $0x200] sm:$0xff] }
  0xc2   :  { %879 = vmatprep.subr.mxu1 %v164_v38  ;;  %1557 = vmatpush1.msra.mxu0 %v992_v39  ;;  %v1153_v37 = vld [vmem:[#allocation8 + $0x508] sm:$0xff]  ;;  %v1152_v38 = vld [vmem:[#allocation8 + $0x500] sm:$0xff] }
  0xc3   :  { %880 = vmatpush1.msra.mxu1 %v163_v40  ;;  %1558 = vmatprep.subr.mxu0 %v1117_v41  ;;  %v1309_v39 = vld [vmem:[#allocation8 + $0x9e8] sm:$0xff]  ;;  %v1148_v41 = vld [vmem:[#allocation8 + $0x4e0] sm:$0xff] }
  0xc4   :  { %881 = vmatprep.subr.mxu1 %v156_v42  ;;  %1559 = vmatpush2.msra.mxu0 %v1116_v43  ;;  %v1149_v40 = vld [vmem:[#allocation8 + $0x4e8] sm:$0xff]  ;;  %v1144_v43 = vld [vmem:[#allocation8 + $0x4c0] sm:$0xff] }
  0xc5   :  { %882 = vmatpush1.msra.mxu1 %v155_v53  ;;  %1560 = vmatprep.subr.mxu0 %v1113_v45  ;;  %v1145_v42 = vld [vmem:[#allocation8 + $0x4c8] sm:$0xff]  ;;  %v1140_v45 = vld [vmem:[#allocation8 + $0x4a0] sm:$0xff] }
  0xc6   :  { %883 = vmatprep.subr.mxu1 %v148_v46  ;;  %1561 = vmatpush2.msra.mxu0 %v1112_v47  ;;  %v1141_v53 = vld [vmem:[#allocation8 + $0x4a8] sm:$0xff]  ;;  %v1136_v47 = vld [vmem:[#allocation8 + $0x480] sm:$0xff] }
  0xc7   :  { %884 = vmatpush1.msra.mxu1 %v147_v48  ;;  %1562 = vmatprep.subr.mxu0 %v1109_v49  ;;  %v1137_v46 = vld [vmem:[#allocation8 + $0x488] sm:$0xff]  ;;  %v1132_v49 = vld [vmem:[#allocation8 + $0x460] sm:$0xff] }
  0xc8   :  { %885 = vmatprep.subr.mxu1 %v140_v50  ;;  %1563 = vmatpush2.msra.mxu0 %v1108_v51  ;;  %v1133_v48 = vld [vmem:[#allocation8 + $0x468] sm:$0xff]  ;;  %v1128_v51 = vld [vmem:[#allocation8 + $0x440] sm:$0xff] }
  0xc9   :  { %886 = vmatpush1.msra.mxu1 %v139_v52  ;;  %1564 = vmatprep.subr.mxu0 %v1105_v54  ;;  %v1129_v50 = vld [vmem:[#allocation8 + $0x448] sm:$0xff]  ;;  %v1124_v54 = vld [vmem:[#allocation8 + $0x420] sm:$0xff] }
  0xca   :  { %887 = vmatprep.subr.mxu1 %v132_v55  ;;  %1565 = vmatpush2.msra.mxu0 %v1104_v56  ;;  %v1125_v52 = vld [vmem:[#allocation8 + $0x428] sm:$0xff]  ;;  %v1120_v56 = vld [vmem:[#allocation8 + $0x400] sm:$0xff] }
  0xcb   :  { %888 = vmatpush1.msra.mxu1 %v131_v57  ;;  %1566 = vmatprep.subr.mxu0 %v1101_v58  ;;  %v1121_v55 = vld [vmem:[#allocation8 + $0x408] sm:$0xff]  ;;  %v1244_v58 = vld [vmem:[#allocation8 + $0x7e0] sm:$0xff] }
  0xcc   :  { %889 = vmatprep.subr.mxu1 %v124_v59  ;;  %1567 = vmatpush2.msra.mxu0 %v1100_v60  ;;  %v1245_v57 = vld [vmem:[#allocation8 + $0x7e8] sm:$0xff]  ;;  %v1240_v60 = vld [vmem:[#allocation8 + $0x7c0] sm:$0xff] }
  0xcd   :  { %890 = vmatpush1.msra.mxu1 %v123_v61  ;;  %1568 = vmatprep.subr.mxu0 %v1097_v62  ;;  %v1241_v59 = vld [vmem:[#allocation8 + $0x7c8] sm:$0xff]  ;;  %v1236_v62 = vld [vmem:[#allocation8 + $0x7a0] sm:$0xff] }
  0xce   :  { %891 = vmatprep.subr.mxu1 %v116_v63  ;;  %1569 = vmatpush2.msra.mxu0 %v1096_v1  ;;  %v1237_v61 = vld [vmem:[#allocation8 + $0x7a8] sm:$0xff]  ;;  %v1232_v1 = vld [vmem:[#allocation8 + $0x780] sm:$0xff] }
  0xcf   :  { %892 = vmatpush1.msra.mxu1 %v115_v2  ;;  %1570 = vmatprep.subr.mxu0 %v1093_v3  ;;  %v1233_v63 = vld [vmem:[#allocation8 + $0x788] sm:$0xff]  ;;  %v1228_v3 = vld [vmem:[#allocation8 + $0x760] sm:$0xff] }
  0xd0   :  { %893 = vmatprep.subr.mxu1 %v108_v4  ;;  %1571 = vmatpush2.msra.mxu0 %v1092_v5  ;;  %v1229_v2 = vld [vmem:[#allocation8 + $0x768] sm:$0xff]  ;;  %v1224_v5 = vld [vmem:[#allocation8 + $0x740] sm:$0xff] }
  0xd1   :  { %894 = vmatpush1.msra.mxu1 %v107_v6  ;;  %1572 = vmatprep.subr.mxu0 %v1089_v7  ;;  %v1225_v4 = vld [vmem:[#allocation8 + $0x748] sm:$0xff]  ;;  %v1220_v7 = vld [vmem:[#allocation8 + $0x720] sm:$0xff] }
  0xd2   :  { %2259 = vmatmul.mubr.msk.f32.vlgmr.msra.gmra.mxu1 %vm310_vm1, %v2541_v44  ;;  %1573 = vmatpush2.msra.mxu0 %v1088_v8  ;;  %v1072_v44 = vld [vmem:[#allocation8 + $0x280] sm:$0xff]  ;;  %v1221_v6 = vld [vmem:[#allocation8 + $0x728] sm:$0xff] }
  0xd3   :  { %1574 = vmatprep.subr.mxu0 %v1085_v9  ;;  %1597 = vmatprep.subr.mxu1 %v1181_v10  ;;  %v1217_v8 = vld [vmem:[#allocation8 + $0x708] sm:$0xff]  ;;  %v1216_v9 = vld [vmem:[#allocation8 + $0x700] sm:$0xff] }
  0xd4   :  { %1575 = vmatpush2.msra.mxu0 %v1084_v11  ;;  %1598 = vmatpush1.msra.mxu1 %v1180_v12  ;;  %v1213_v10 = vld [vmem:[#allocation8 + $0x6e8] sm:$0xff]  ;;  %v1212_v11 = vld [vmem:[#allocation8 + $0x6e0] sm:$0xff] }
  0xd5   :  { %1576 = vmatprep.subr.mxu0 %v1081_v13  ;;  %1599 = vmatprep.subr.mxu1 %v1177_v14  ;;  %v1209_v12 = vld [vmem:[#allocation8 + $0x6c8] sm:$0xff]  ;;  %v1208_v13 = vld [vmem:[#allocation8 + $0x6c0] sm:$0xff] }
  0xd6   :  { %1577 = vmatpush2.msra.mxu0 %v1080_v15  ;;  %1600 = vmatpush1.msra.mxu1 %v1176_v16  ;;  %v1205_v14 = vld [vmem:[#allocation8 + $0x6a8] sm:$0xff]  ;;  %v1204_v15 = vld [vmem:[#allocation8 + $0x6a0] sm:$0xff] }
  0xd7   :  { %1578 = vmatprep.subr.mxu0 %v1077_v17  ;;  %1601 = vmatprep.subr.mxu1 %v1173_v18  ;;  %v1201_v16 = vld [vmem:[#allocation8 + $0x688] sm:$0xff]  ;;  %v1200_v17 = vld [vmem:[#allocation8 + $0x680] sm:$0xff] }
  0xd8   :  { %1579 = vmatpush2.msra.mxu0 %v1076_v19  ;;  %1602 = vmatpush1.msra.mxu1 %v1172_v20  ;;  %v1197_v18 = vld [vmem:[#allocation8 + $0x668] sm:$0xff]  ;;  %v1196_v19 = vld [vmem:[#allocation8 + $0x660] sm:$0xff] }
  0xd9   :  { %1580 = vmatprep.subr.mxu0 %v1073_v21  ;;  %1603 = vmatprep.subr.mxu1 %v1169_v22  ;;  %v1193_v20 = vld [vmem:[#allocation8 + $0x648] sm:$0xff]  ;;  %v1192_v21 = vld [vmem:[#allocation8 + $0x640] sm:$0xff] }
  0xda   :  { %1581 = vmatpush2.msra.mxu0 %v1072_v44  ;;  %1604 = vmatpush1.msra.mxu1 %v1168_v23  ;;  %v1189_v22 = vld [vmem:[#allocation8 + $0x628] sm:$0xff]  ;;  %v1188_v44 = vld [vmem:[#allocation8 + $0x620] sm:$0xff] }
  0xdb   :  { %1582 = vmatprep.subr.mxu0 %v1069_v24  ;;  %1605 = vmatprep.subr.mxu1 %v1165_v25  ;;  %v1185_v23 = vld [vmem:[#allocation8 + $0x608] sm:$0xff]  ;;  %v1184_v24 = vld [vmem:[#allocation8 + $0x600] sm:$0xff] }
  0xdc   :  { %1583 = vmatpush2.msra.mxu0 %v1068_v26  ;;  %1606 = vmatpush1.msra.mxu1 %v1164_v27  ;;  %v1437_v25 = vld [vmem:[#allocation8 + $0xde8] sm:$0xff]  ;;  %v936_v26 = vlaneseq }
  0xdd   :  { %1584 = vmatprep.subr.mxu0 %v1065_v28  ;;  %1607 = vmatprep.subr.mxu1 %v1161_v29 }
  0xde   :  { %1585 = vmatpush2.msra.mxu0 %v1064_v30  ;;  %1608 = vmatpush1.msra.mxu1 %v1160_v31  ;;  %v2570_v28 = vshrl.u32 %v936_v26, 7  ;;  %v2575_v31 = vld [vmem:[#allocation11] sm:$0xff] }
  0xdf   :  { %1586 = vmatprep.subr.mxu0 %v1061_v32  ;;  %1609 = vmatprep.subr.mxu1 %v1157_v33 }
  0xe0   :  { %1587 = vmatpush2.msra.mxu0 %v1060_v34  ;;  %1610 = vmatpush1.msra.mxu1 %v1156_v35  ;;  %v938_v30 = vsub.s32 0, %v2570_v28  ;;  %v942_v32 = vsub.s32 1, %v2570_v28 }
  0xe1   :  { %1588 = vmatprep.subr.mxu0 %v1057_v36  ;;  %1611 = vmatprep.subr.mxu1 %v1153_v37 }
  0xe2   :  { %1589 = vmatpush2.msra.mxu0 %v1056_v0  ;;  %1612 = vmatpush1.msra.mxu1 %v1152_v38  ;;  %v939_v35 = vrot.slane %v2575_v31, %v938_v30  ;;  %v943_v37 = vrot.slane %v2575_v31, %v942_v32 }
  0xe3   :  { %1668 = vmatprep.subr.mxu0 %v1309_v39  ;;  %1613 = vmatprep.subr.mxu1 %v1149_v40 }
  0xe4   :  { %1614 = vmatpush1.msra.mxu1 %v1148_v41 }
  0xe5   :  { %1615 = vmatprep.subr.mxu1 %v1145_v42 }
  0xe6   :  { %1616 = vmatpush1.msra.mxu1 %v1144_v43 }
  0xe7   :  { %1617 = vmatprep.subr.mxu1 %v1141_v53  ;;  %v1308_v53 = vld [vmem:[#allocation8 + $0x9e0] sm:$0xff] }
  0xe8   :  { %1618 = vmatpush1.msra.mxu1 %v1140_v45  ;;  %v1305_v45 = vld [vmem:[#allocation8 + $0x9c8] sm:$0xff] }
  0xe9   :  { %1619 = vmatprep.subr.mxu1 %v1137_v46  ;;  %v1304_v46 = vld [vmem:[#allocation8 + $0x9c0] sm:$0xff] }
  0xea   :  { %1620 = vmatpush1.msra.mxu1 %v1136_v47  ;;  %v1301_v47 = vld [vmem:[#allocation8 + $0x9a8] sm:$0xff] }
  0xeb   :  { %1621 = vmatprep.subr.mxu1 %v1133_v48  ;;  %v1300_v48 = vld [vmem:[#allocation8 + $0x9a0] sm:$0xff] }
  0xec   :  { %1622 = vmatpush1.msra.mxu1 %v1132_v49  ;;  %v1297_v49 = vld [vmem:[#allocation8 + $0x988] sm:$0xff] }
  0xed   :  { %1623 = vmatprep.subr.mxu1 %v1129_v50  ;;  %v1296_v50 = vld [vmem:[#allocation8 + $0x980] sm:$0xff] }
  0xee   :  { %1624 = vmatpush1.msra.mxu1 %v1128_v51  ;;  %v1293_v51 = vld [vmem:[#allocation8 + $0x968] sm:$0xff] }
  0xef   :  { %1625 = vmatprep.subr.mxu1 %v1125_v52  ;;  %v1292_v52 = vld [vmem:[#allocation8 + $0x960] sm:$0xff] }
  0xf0   :  { %1626 = vmatpush1.msra.mxu1 %v1124_v54  ;;  %v1289_v54 = vld [vmem:[#allocation8 + $0x948] sm:$0xff] }
  0xf1   :  { %1627 = vmatprep.subr.mxu1 %v1121_v55  ;;  %v1288_v55 = vld [vmem:[#allocation8 + $0x940] sm:$0xff] }
  0xf2   :  { %1628 = vmatpush1.msra.mxu1 %v1120_v56  ;;  %v1285_v56 = vld [vmem:[#allocation8 + $0x928] sm:$0xff] }
  0xf3   :  { %1629 = vmatprep.subr.mxu1 %v1245_v57  ;;  %v1284_v57 = vld [vmem:[#allocation8 + $0x920] sm:$0xff] }
  0xf4   :  { %1630 = vmatpush2.msra.mxu1 %v1244_v58  ;;  %v1281_v58 = vld [vmem:[#allocation8 + $0x908] sm:$0xff] }
  0xf5   :  { %1631 = vmatprep.subr.mxu1 %v1241_v59  ;;  %v1280_v59 = vld [vmem:[#allocation8 + $0x900] sm:$0xff] }
  0xf6   :  { %1632 = vmatpush2.msra.mxu1 %v1240_v60  ;;  %v1277_v60 = vld [vmem:[#allocation8 + $0x8e8] sm:$0xff] }
  0xf7   :  { %1633 = vmatprep.subr.mxu1 %v1237_v61  ;;  %v1276_v61 = vld [vmem:[#allocation8 + $0x8e0] sm:$0xff] }
  0xf8   :  { %1634 = vmatpush2.msra.mxu1 %v1236_v62  ;;  %v1273_v62 = vld [vmem:[#allocation8 + $0x8c8] sm:$0xff] }
  0xf9   :  { %1635 = vmatprep.subr.mxu1 %v1233_v63  ;;  %v958_v63 = vsub.s32 5, %v2570_v28 }
  0xfa   :  { %1636 = vmatpush2.msra.mxu1 %v1232_v1  ;;  %v1272_v1 = vld [vmem:[#allocation8 + $0x8c0] sm:$0xff] }
  0xfb   :  { %1637 = vmatprep.subr.mxu1 %v1229_v2  ;;  %v1269_v2 = vld [vmem:[#allocation8 + $0x8a8] sm:$0xff] }
  0xfc   :  { %1638 = vmatpush2.msra.mxu1 %v1228_v3 }
  0xfd   :  { %1639 = vmatprep.subr.mxu1 %v1225_v4  ;;  %v1268_v4 = vld [vmem:[#allocation8 + $0x8a0] sm:$0xff] }
  0xfe   :  { %1640 = vmatpush2.msra.mxu1 %v1224_v5  ;;  %v959_v5 = vrot.slane %v2575_v31, %v958_v63  ;;  %v954_v63 = vsub.s32 4, %v2570_v28 }
  0xff   :  { %1641 = vmatprep.subr.mxu1 %v1221_v6  ;;  %v1265_v6 = vld [vmem:[#allocation8 + $0x888] sm:$0xff] }
 0x100   :  { %1642 = vmatpush2.msra.mxu1 %v1220_v7 }
 0x101   :  { %1643 = vmatprep.subr.mxu1 %v1217_v8  ;;  %v1264_v8 = vld [vmem:[#allocation8 + $0x880] sm:$0xff] }
 0x102   :  { %1644 = vmatpush2.msra.mxu1 %v1216_v9 }
 0x103   :  { %1645 = vmatprep.subr.mxu1 %v1213_v10  ;;  %v1261_v10 = vld [vmem:[#allocation8 + $0x868] sm:$0xff] }
 0x104   :  { %1646 = vmatpush2.msra.mxu1 %v1212_v11  ;;  %v1260_v11 = vld [vmem:[#allocation8 + $0x860] sm:$0xff] }
 0x105   :  { %1647 = vmatprep.subr.mxu1 %v1209_v12 }
 0x106   :  { %1648 = vmatpush2.msra.mxu1 %v1208_v13  ;;  %v1257_v13 = vld [vmem:[#allocation8 + $0x848] sm:$0xff] }
 0x107   :  { %1649 = vmatprep.subr.mxu1 %v1205_v14  ;;  %v1256_v14 = vld [vmem:[#allocation8 + $0x840] sm:$0xff] }
 0x108   :  { %1650 = vmatpush2.msra.mxu1 %v1204_v15 }
 0x109   :  { %1651 = vmatprep.subr.mxu1 %v1201_v16  ;;  %v1253_v16 = vld [vmem:[#allocation8 + $0x828] sm:$0xff] }
 0x10a   :  { %1652 = vmatpush2.msra.mxu1 %v1200_v17  ;;  %v1252_v17 = vld [vmem:[#allocation8 + $0x820] sm:$0xff] }
 0x10b   :  { %1653 = vmatprep.subr.mxu1 %v1197_v18  ;;  %v1249_v18 = vld [vmem:[#allocation8 + $0x808] sm:$0xff] }
 0x10c   :  { %1654 = vmatpush2.msra.mxu1 %v1196_v19  ;;  %v1248_v19 = vld [vmem:[#allocation8 + $0x800] sm:$0xff] }
 0x10d   :  { %1655 = vmatprep.subr.mxu1 %v1193_v20  ;;  %v1373_v20 = vld [vmem:[#allocation8 + $0xbe8] sm:$0xff] }
 0x10e   :  { %1656 = vmatpush2.msra.mxu1 %v1192_v21  ;;  %v1372_v21 = vld [vmem:[#allocation8 + $0xbe0] sm:$0xff] }
 0x10f   :  { %1657 = vmatprep.subr.mxu1 %v1189_v22 }
 0x110   :  { %1658 = vmatpush2.msra.mxu1 %v1188_v44  ;;  %v1369_v44 = vld [vmem:[#allocation8 + $0xbc8] sm:$0xff] }
 0x111   :  { %1659 = vmatprep.subr.mxu1 %v1185_v23  ;;  %v1368_v23 = vld [vmem:[#allocation8 + $0xbc0] sm:$0xff] }
 0x112   :  { %1660 = vmatpush2.msra.mxu1 %v1184_v24  ;;  %v1365_v24 = vld [vmem:[#allocation8 + $0xba8] sm:$0xff] }
 0x113   :  { %1739 = vmatprep.subr.mxu1 %v1437_v25  ;;  %v1364_v25 = vld [vmem:[#allocation8 + $0xba0] sm:$0xff] }
 0x126   :  { %v405_v33 = vpop.f32.mrf.mxu1 }
 0x128   :  { %v2568_v27 = vpop.f32.mrf.mxu0  ;;  %v407_v0 = vpop.f32.mrf.mxu1 }
 0x12a   :  { %v2572_v29 = vpop.f32.mrf.mxu0 }
 0x142   :  { %v476_v22 = vpop.f32.mrf.mxu1 }
 0x143   :  { %v716_v34 = vpop.f32.mrf.mxu0 }
 0x144   :  { %v717_v36 = vadd.f32 %v716_v34, %v405_v33  ;;  %v478_v26 = vpop.f32.mrf.mxu1  ;;  %v1360_v33 = vld [vmem:[#allocation8 + $0xb80] sm:$0xff] }
 0x145   :  { %v718_v38 = vpop.f32.mrf.mxu0 }
 0x146   :  { %v719_v39 = vadd.f32 %v718_v38, %v407_v0  ;;  %v2584_v40 = vadd.f32 %v939_v35, %v717_v36  ;;  %v1357_v35 = vld [vmem:[#allocation8 + $0xb68] sm:$0xff]  ;;  %v1356_v36 = vld [vmem:[#allocation8 + $0xb60] sm:$0xff]  ;;  %v946_v0 = vsub.s32 2, %v2570_v28 }
 0x147   :  { %v1352_v38 = vld [vmem:[#allocation8 + $0xb40] sm:$0xff] }
 0x148   :  { %v2586_v41 = vadd.f32 %v943_v37, %v719_v39  ;;  %v984_v43 = vmax.f32 %v2584_v40, 0.0  ;;  %v1353_v37 = vld [vmem:[#allocation8 + $0xb48] sm:$0xff]  ;;  %v950_v39 = vsub.s32 3, %v2570_v28  ;;  %v1147_v40 = vld [vmem:[#allocation8 + $0x4d8] sm:$0xff] }
 0x14a   :  { %v985_v42 = vmax.f32 %v2586_v41, 0.0  ;;  %v1397_v41 = vld [vmem:[#allocation8 + $0xca8] sm:$0xff] }
 0x14c   :  { %1590 = vmatprep.mubr.f32.mxu0 %v985_v42 }
 0x14d   :  { %1591 = vmatmul.mubr.f32.vlgmr.msra.gmra.mxu0 %v984_v43 }
 0x14e   :  { %1669 = vmatpush1.msra.mxu0 %v1308_v53 }
 0x14f   :  { %1670 = vmatprep.subr.mxu0 %v1305_v45  ;;  %v1349_v45 = vld [vmem:[#allocation8 + $0xb28] sm:$0xff] }
 0x150   :  { %1671 = vmatpush1.msra.mxu0 %v1304_v46  ;;  %v1348_v46 = vld [vmem:[#allocation8 + $0xb20] sm:$0xff] }
 0x151   :  { %1672 = vmatprep.subr.mxu0 %v1301_v47 }
 0x152   :  { %1673 = vmatpush1.msra.mxu0 %v1300_v48  ;;  %v947_v48 = vrot.slane %v2575_v31, %v946_v0 }
 0x153   :  { %1674 = vmatprep.subr.mxu0 %v1297_v49  ;;  %v1345_v49 = vld [vmem:[#allocation8 + $0xb08] sm:$0xff] }
 0x154   :  { %1675 = vmatpush1.msra.mxu0 %v1296_v50 }
 0x155   :  { %1676 = vmatprep.subr.mxu0 %v1293_v51  ;;  %v951_v51 = vrot.slane %v2575_v31, %v950_v39 }
 0x156   :  { %1677 = vmatpush1.msra.mxu0 %v1292_v52  ;;  %v1344_v52 = vld [vmem:[#allocation8 + $0xb00] sm:$0xff] }
 0x157   :  { %1678 = vmatprep.subr.mxu0 %v1289_v54 }
 0x158   :  { %1679 = vmatpush1.msra.mxu0 %v1288_v55  ;;  %v1341_v55 = vld [vmem:[#allocation8 + $0xae8] sm:$0xff] }
 0x159   :  { %1680 = vmatprep.subr.mxu0 %v1285_v56 }
 0x15a   :  { %1681 = vmatpush1.msra.mxu0 %v1284_v57  ;;  %v1340_v57 = vld [vmem:[#allocation8 + $0xae0] sm:$0xff] }
 0x15b   :  { %1682 = vmatprep.subr.mxu0 %v1281_v58 }
 0x15c   :  { %1683 = vmatpush1.msra.mxu0 %v1280_v59  ;;  %v1337_v59 = vld [vmem:[#allocation8 + $0xac8] sm:$0xff] }
 0x15d   :  { %1684 = vmatprep.subr.mxu0 %v1277_v60 }
 0x15e   :  { %1685 = vmatpush1.msra.mxu0 %v1276_v61  ;;  %v2604_v34 = vpop.f32.mrf.mxu1  ;;  %v1336_v61 = vld [vmem:[#allocation8 + $0xac0] sm:$0xff] }
 0x15f   :  { %v2595_v3 = vpop.f32.mrf.mxu0  ;;  %1686 = vmatprep.subr.mxu0 %v1273_v62  ;;  %v1333_v62 = vld [vmem:[#allocation8 + $0xaa8] sm:$0xff] }
 0x160   :  { %1687 = vmatpush1.msra.mxu0 %v1272_v1  ;;  %v2608_v53 = vpop.f32.mrf.mxu1 }
 0x161   :  { %v860_v7 = vpop.f32.mrf.mxu0  ;;  %1688 = vmatprep.subr.mxu0 %v1269_v2  ;;  %v1332_v2 = vld [vmem:[#allocation8 + $0xaa0] sm:$0xff] }
 0x162   :  { %v861_v9 = vadd.f32 %v860_v7, %v2572_v29  ;;  %1689 = vmatpush1.msra.mxu0 %v1268_v4  ;;  %v1361_v29 = vld [vmem:[#allocation8 + $0xb88] sm:$0xff] }
 0x163   :  { %1690 = vmatprep.subr.mxu0 %v1265_v6  ;;  %v1329_v6 = vld [vmem:[#allocation8 + $0xa88] sm:$0xff] }
 0x164   :  { %v2599_v12 = vadd.f32 %v959_v5, %v861_v9  ;;  %1691 = vmatpush1.msra.mxu0 %v1264_v8  ;;  %v1436_v5 = vld [vmem:[#allocation8 + $0xde0] sm:$0xff]  ;;  %v1433_v7 = vld [vmem:[#allocation8 + $0xdc8] sm:$0xff] }
 0x165   :  { %1692 = vmatprep.subr.mxu0 %v1261_v10  ;;  %v1328_v8 = vld [vmem:[#allocation8 + $0xa80] sm:$0xff]  ;;  %v1325_v10 = vld [vmem:[#allocation8 + $0xa68] sm:$0xff] }
 0x166   :  { %v989_v15 = vmax.f32 %v2599_v12, 0.0  ;;  %1693 = vmatpush1.msra.mxu0 %v1260_v11  ;;  %v1432_v9 = vld [vmem:[#allocation8 + $0xdc0] sm:$0xff]  ;;  %v859_v11 = vadd.f32 %v2595_v3, %v2568_v27  ;;  %v1421_v27 = vld [vmem:[#allocation8 + $0xd68] sm:$0xff]  ;;  %v1142_v12 = vld [vmem:[#allocation8 + $0x4b0] sm:$0xff] }
 0x167   :  { %1694 = vmatprep.subr.mxu0 %v1257_v13  ;;  %v955_v13 = vrot.slane %v2575_v31, %v954_v63  ;;  %v1316_v3 = vld [vmem:[#allocation8 + $0xa20] sm:$0xff]  ;;  %v1039_v63 = vld [vmem:[#allocation8 + $0x178] sm:$0xff] }
 0x168   :  { %1732 = vmatprep.mubr.f32.mxu0 %v989_v15  ;;  %1695 = vmatpush1.msra.mxu0 %v1256_v14  ;;  %v1429_v14 = vld [vmem:[#allocation8 + $0xda8] sm:$0xff] }
 0x169   :  { %1696 = vmatprep.subr.mxu0 %v1253_v16  ;;  %v1324_v16 = vld [vmem:[#allocation8 + $0xa60] sm:$0xff] }
 0x16a   :  { %1697 = vmatpush1.msra.mxu0 %v1252_v17  ;;  %v1428_v17 = vld [vmem:[#allocation8 + $0xda0] sm:$0xff] }
 0x16b   :  { %1698 = vmatprep.subr.mxu0 %v1249_v18  ;;  %v1321_v18 = vld [vmem:[#allocation8 + $0xa48] sm:$0xff] }
 0x16c   :  { %1699 = vmatpush1.msra.mxu0 %v1248_v19  ;;  %v1425_v19 = vld [vmem:[#allocation8 + $0xd88] sm:$0xff] }
 0x16d   :  { %1700 = vmatprep.subr.mxu0 %v1373_v20  ;;  %v1320_v20 = vld [vmem:[#allocation8 + $0xa40] sm:$0xff] }
 0x16e   :  { %1701 = vmatpush2.msra.mxu0 %v1372_v21  ;;  %v1424_v21 = vld [vmem:[#allocation8 + $0xd80] sm:$0xff] }
 0x16f   :  { %1702 = vmatprep.subr.mxu0 %v1369_v44  ;;  %v2630_v44 = vadd.f32 %v955_v13, %v859_v11  ;;  %v1034_v11 = vld [vmem:[#allocation8 + $0x150] sm:$0xff]  ;;  %v1389_v13 = vld [vmem:[#allocation8 + $0xc68] sm:$0xff] }
 0x170   :  { %1703 = vmatpush2.msra.mxu0 %v1368_v23  ;;  %v1420_v23 = vld [vmem:[#allocation8 + $0xd60] sm:$0xff] }
 0x171   :  { %1704 = vmatprep.subr.mxu0 %v1365_v24  ;;  %v1313_v24 = vld [vmem:[#allocation8 + $0xa08] sm:$0xff] }
 0x172   :  { %1705 = vmatpush2.msra.mxu0 %v1364_v25  ;;  %v1417_v25 = vld [vmem:[#allocation8 + $0xd48] sm:$0xff] }
 0x173   :  { %1706 = vmatprep.subr.mxu0 %v1361_v29  ;;  %v1416_v29 = vld [vmem:[#allocation8 + $0xd40] sm:$0xff] }
 0x174   :  { %1707 = vmatpush2.msra.mxu0 %v1360_v33  ;;  %v988_v33 = vmax.f32 %v2630_v44, 0.0  ;;  %v1391_v44 = vld [vmem:[#allocation8 + $0xc78] sm:$0xff] }
 0x175   :  { %1708 = vmatprep.subr.mxu0 %v1357_v35  ;;  %v1413_v35 = vld [vmem:[#allocation8 + $0xd28] sm:$0xff] }
 0x176   :  { %1709 = vmatpush2.msra.mxu0 %v1356_v36  ;;  %v1055_v36 = vld [vmem:[#allocation8 + $0x1f8] sm:$0xff] }
 0x177   :  { %1710 = vmatprep.subr.mxu0 %v1353_v37  ;;  %v1412_v37 = vld [vmem:[#allocation8 + $0xd20] sm:$0xff] }
 0x178   :  { %v787_v47 = vpop.f32.mrf.mxu1  ;;  %1711 = vmatpush2.msra.mxu0 %v1352_v38  ;;  %v1054_v38 = vld [vmem:[#allocation8 + $0x1f0] sm:$0xff] }
 0x179   :  { %v788_v50 = vadd.f32 %v787_v47, %v476_v22  ;;  %1712 = vmatprep.subr.mxu0 %v1349_v45  ;;  %v1317_v22 = vld [vmem:[#allocation8 + $0xa28] sm:$0xff]  ;;  %v1408_v47 = vld [vmem:[#allocation8 + $0xd00] sm:$0xff] }
 0x17a   :  { %v789_v54 = vpop.f32.mrf.mxu1  ;;  %1713 = vmatpush2.msra.mxu0 %v1348_v46  ;;  %v1409_v45 = vld [vmem:[#allocation8 + $0xd08] sm:$0xff]  ;;  %v1051_v46 = vld [vmem:[#allocation8 + $0x1d8] sm:$0xff] }
 0x17b   :  { %v790_v56 = vadd.f32 %v789_v54, %v478_v26  ;;  %1714 = vmatprep.subr.mxu0 %v1345_v49  ;;  %v2616_v58 = vadd.f32 %v947_v48, %v788_v50  ;;  %v1312_v26 = vld [vmem:[#allocation8 + $0xa00] sm:$0xff]  ;;  %v1050_v48 = vld [vmem:[#allocation8 + $0x1d0] sm:$0xff]  ;;  %v1405_v49 = vld [vmem:[#allocation8 + $0xce8] sm:$0xff]  ;;  %v966_v50 = vsub.s32 7, %v2570_v28 }
 0x17c   :  { %1715 = vmatpush2.msra.mxu0 %v1344_v52  ;;  %v1404_v52 = vld [vmem:[#allocation8 + $0xce0] sm:$0xff]  ;;  %v1046_v54 = vld [vmem:[#allocation8 + $0x1b0] sm:$0xff] }
 0x17d   :  { %v2618_v60 = vadd.f32 %v951_v51, %v790_v56  ;;  %1716 = vmatprep.subr.mxu0 %v1341_v55  ;;  %v986_v4 = vmax.f32 %v2616_v58, 0.0  ;;  %v1047_v51 = vld [vmem:[#allocation8 + $0x1b8] sm:$0xff]  ;;  %v1401_v55 = vld [vmem:[#allocation8 + $0xcc8] sm:$0xff] }
 0x17e   :  { %1717 = vmatpush2.msra.mxu0 %v1340_v57  ;;  %v1043_v57 = vld [vmem:[#allocation8 + $0x198] sm:$0xff] }
 0x17f   :  { %v987_v1 = vmax.f32 %v2618_v60, 0.0  ;;  %1718 = vmatprep.subr.mxu0 %v1337_v59  ;;  %v1400_v59 = vld [vmem:[#allocation8 + $0xcc0] sm:$0xff]  ;;  %v1062_v60 = vld [vmem:[#allocation8 + $0x230] sm:$0xff]  ;;  %v1323_v58 = vld [vmem:[#allocation8 + $0xa58] sm:$0xff] }
 0x180   :  { %1719 = vmatpush2.msra.mxu0 %v1336_v61  ;;  %v967_v61 = vrot.slane %v2575_v31, %v966_v50  ;;  %v1007_v50 = vld [vmem:[#allocation8 + $0x78] sm:$0xff] }
 0x181   :  { %1661 = vmatprep.mubr.f32.mxu1 %v987_v1  ;;  %1720 = vmatprep.subr.mxu0 %v1333_v62  ;;  %v1042_v62 = vld [vmem:[#allocation8 + $0x190] sm:$0xff] }
 0x182   :  { %1662 = vmatmul.mubr.f32.vlgmr.msra.gmra.mxu1 %v986_v4  ;;  %1721 = vmatpush2.msra.mxu0 %v1332_v2  ;;  %v1396_v2 = vld [vmem:[#allocation8 + $0xca0] sm:$0xff] }
 0x183   :  { %1740 = vmatpush1.msra.mxu1 %v1436_v5  ;;  %1722 = vmatprep.subr.mxu0 %v1329_v6  ;;  %v1038_v6 = vld [vmem:[#allocation8 + $0x170] sm:$0xff] }
 0x184   :  { %1741 = vmatprep.subr.mxu1 %v1433_v7  ;;  %1723 = vmatpush2.msra.mxu0 %v1328_v8  ;;  %v1393_v7 = vld [vmem:[#allocation8 + $0xc88] sm:$0xff]  ;;  %v1035_v8 = vld [vmem:[#allocation8 + $0x158] sm:$0xff] }
 0x185   :  { %1742 = vmatpush1.msra.mxu1 %v1432_v9  ;;  %1724 = vmatprep.subr.mxu0 %v1325_v10  ;;  %v1392_v9 = vld [vmem:[#allocation8 + $0xc80] sm:$0xff] }
 0x186   :  { %1743 = vmatprep.subr.mxu1 %v1429_v14  ;;  %1725 = vmatpush2.msra.mxu0 %v1324_v16  ;;  %v1031_v14 = vld [vmem:[#allocation8 + $0x138] sm:$0xff]  ;;  %v1388_v16 = vld [vmem:[#allocation8 + $0xc60] sm:$0xff] }
 0x187   :  { %1744 = vmatpush1.msra.mxu1 %v1428_v17  ;;  %1726 = vmatprep.subr.mxu0 %v1321_v18  ;;  %v1385_v18 = vld [vmem:[#allocation8 + $0xc48] sm:$0xff] }
 0x188   :  { %1745 = vmatprep.subr.mxu1 %v1425_v19  ;;  %1727 = vmatpush2.msra.mxu0 %v1320_v20  ;;  %v1027_v19 = vld [vmem:[#allocation8 + $0x118] sm:$0xff]  ;;  %v1384_v20 = vld [vmem:[#allocation8 + $0xc40] sm:$0xff] }
 0x189   :  { %1746 = vmatpush1.msra.mxu1 %v1424_v21  ;;  %1728 = vmatprep.subr.mxu0 %v1317_v22  ;;  %v1026_v21 = vld [vmem:[#allocation8 + $0x110] sm:$0xff]  ;;  %v1381_v22 = vld [vmem:[#allocation8 + $0xc28] sm:$0xff] }
 0x18a   :  { %1747 = vmatprep.subr.mxu1 %v1421_v27  ;;  %1729 = vmatpush2.msra.mxu0 %v1316_v3  ;;  %v1023_v27 = vld [vmem:[#allocation8 + $0xf8] sm:$0xff]  ;;  %v1380_v3 = vld [vmem:[#allocation8 + $0xc20] sm:$0xff] }
 0x18b   :  { %1748 = vmatpush1.msra.mxu1 %v1420_v23  ;;  %1730 = vmatprep.subr.mxu0 %v1313_v24  ;;  %v1022_v23 = vld [vmem:[#allocation8 + $0xf0] sm:$0xff]  ;;  %v1377_v24 = vld [vmem:[#allocation8 + $0xc08] sm:$0xff] }
 0x18c   :  { %1749 = vmatprep.subr.mxu1 %v1417_v25  ;;  %1731 = vmatpush2.msra.mxu0 %v1312_v26  ;;  %v1019_v25 = vld [vmem:[#allocation8 + $0xd8] sm:$0xff]  ;;  %v1376_v26 = vld [vmem:[#allocation8 + $0xc00] sm:$0xff] }
 0x18d   :  { %1750 = vmatpush1.msra.mxu1 %v1416_v29  ;;  %1733 = vmatmul.mubr.f32.vlgmr.msra.gmra.mxu0 %v988_v33  ;;  %v1018_v29 = vld [vmem:[#allocation8 + $0xd0] sm:$0xff] }
 0x18e   :  { %1751 = vmatprep.subr.mxu1 %v1413_v35  ;;  %1810 = vmatprep.subr.mxu0 %v1055_v36  ;;  %v1501_v35 = vld [vmem:[#allocation8 + $0xfe8] sm:$0xff]  ;;  %v1015_v36 = vld [vmem:[#allocation8 + $0xb8] sm:$0xff] }
 0x18f   :  { %1752 = vmatpush1.msra.mxu1 %v1412_v37  ;;  %1811 = vmatpush1.msra.mxu0 %v1054_v38  ;;  %v1500_v37 = vld [vmem:[#allocation8 + $0xfe0] sm:$0xff]  ;;  %v1014_v38 = vld [vmem:[#allocation8 + $0xb0] sm:$0xff] }
 0x190   :  { %1874 = vmatprep.mubr.f32.mxu0 %v985_v42  ;;  %1753 = vmatprep.subr.mxu1 %v1409_v45  ;;  %v1497_v45 = vld [vmem:[#allocation8 + $0xfc8] sm:$0xff] }
 0x191   :  { %1812 = vmatprep.subr.mxu0 %v1051_v46  ;;  %1754 = vmatpush1.msra.mxu1 %v1408_v47  ;;  %v1011_v46 = vld [vmem:[#allocation8 + $0x98] sm:$0xff]  ;;  %v1496_v47 = vld [vmem:[#allocation8 + $0xfc0] sm:$0xff] }
 0x192   :  { %1813 = vmatpush1.msra.mxu0 %v1050_v48  ;;  %1755 = vmatprep.subr.mxu1 %v1405_v49  ;;  %v2638_v56 = vpop.f32.mrf.mxu1  ;;  %v1010_v48 = vld [vmem:[#allocation8 + $0x90] sm:$0xff]  ;;  %v1493_v49 = vld [vmem:[#allocation8 + $0xfa8] sm:$0xff] }
 0x193   :  { %1814 = vmatprep.subr.mxu0 %v1047_v51  ;;  %1756 = vmatpush1.msra.mxu1 %v1404_v52  ;;  %v1492_v51 = vld [vmem:[#allocation8 + $0xfa0] sm:$0xff]  ;;  %v1006_v52 = vld [vmem:[#allocation8 + $0x70] sm:$0xff] }
 0x194   :  { %1815 = vmatpush1.msra.mxu0 %v1046_v54  ;;  %1757 = vmatprep.subr.mxu1 %v1401_v55  ;;  %v931_v42 = vpop.f32.mrf.mxu1  ;;  %v1489_v54 = vld [vmem:[#allocation8 + $0xf88] sm:$0xff]  ;;  %v1003_v55 = vld [vmem:[#allocation8 + $0x58] sm:$0xff] }
 0x195   :  { %1816 = vmatprep.subr.mxu0 %v1043_v57  ;;  %v932_v5 = vadd.f32 %v931_v42, %v2608_v53  ;;  %1758 = vmatpush1.msra.mxu1 %v1400_v59  ;;  %v1030_v53 = vld [vmem:[#allocation8 + $0x130] sm:$0xff]  ;;  %v1488_v57 = vld [vmem:[#allocation8 + $0xf80] sm:$0xff] }
 0x196   :  { %1817 = vmatpush1.msra.mxu0 %v1042_v62  ;;  %1759 = vmatprep.subr.mxu1 %v1397_v41  ;;  %v1002_v59 = vld [vmem:[#allocation8 + $0x50] sm:$0xff]  ;;  %v999_v62 = vld [vmem:[#allocation8 + $0x38] sm:$0xff]  ;;  %v1484_v41 = vld [vmem:[#allocation8 + $0xf60] sm:$0xff] }
 0x197   :  { %v2642_v10 = vadd.f32 %v967_v61, %v932_v5  ;;  %1818 = vmatprep.subr.mxu0 %v1039_v63  ;;  %1760 = vmatpush1.msra.mxu1 %v1396_v2  ;;  %v1485_v61 = vld [vmem:[#allocation8 + $0xf68] sm:$0xff]  ;;  %v998_v42 = vld [vmem:[#allocation8 + $0x30] sm:$0xff]  ;;  %v995_v2 = vld [vmem:[#allocation8 + $0x18] sm:$0xff] }
 0x198   :  { %1819 = vmatpush1.msra.mxu0 %v1038_v6  ;;  %1761 = vmatprep.subr.mxu1 %v1393_v7  ;;  %v1481_v63 = vld [vmem:[#allocation8 + $0xf48] sm:$0xff]  ;;  %v1480_v5 = vld [vmem:[#allocation8 + $0xf40] sm:$0xff]  ;;  %v994_v6 = vld [vmem:[#allocation8 + $0x10] sm:$0xff] }
 0x199   :  { %v991_v17 = vmax.f32 %v2642_v10, 0.0  ;;  %1820 = vmatprep.subr.mxu0 %v1035_v8  ;;  %1762 = vmatpush1.msra.mxu1 %v1392_v9  ;;  %v1477_v7 = vld [vmem:[#allocation8 + $0xf28] sm:$0xff]  ;;  %v1119_v8 = vld [vmem:[#allocation8 + $0x3f8] sm:$0xff]  ;;  %v1476_v9 = vld [vmem:[#allocation8 + $0xf20] sm:$0xff] }
 0x19a   :  { %1821 = vmatpush1.msra.mxu0 %v1034_v11  ;;  %1763 = vmatprep.subr.mxu1 %v1389_v13  ;;  %v1118_v11 = vld [vmem:[#allocation8 + $0x3f0] sm:$0xff]  ;;  %v1473_v13 = vld [vmem:[#allocation8 + $0xf08] sm:$0xff] }
 0x19b   :  { %1822 = vmatprep.subr.mxu0 %v1031_v14  ;;  %1764 = vmatpush1.msra.mxu1 %v1388_v16  ;;  %v1115_v14 = vld [vmem:[#allocation8 + $0x3d8] sm:$0xff]  ;;  %v1472_v16 = vld [vmem:[#allocation8 + $0xf00] sm:$0xff]  ;;  %v1318_v10 = vld [vmem:[#allocation8 + $0xa30] sm:$0xff] }
 0x19c   :  { %1823 = vmatpush1.msra.mxu0 %v1030_v53  ;;  %1765 = vmatprep.subr.mxu1 %v1385_v18  ;;  %v1114_v53 = vld [vmem:[#allocation8 + $0x3d0] sm:$0xff]  ;;  %v1469_v18 = vld [vmem:[#allocation8 + $0xee8] sm:$0xff] }
 0x19d   :  { %1803 = vmatprep.mubr.f32.mxu1 %v991_v17  ;;  %1824 = vmatprep.subr.mxu0 %v1027_v19  ;;  %v1111_v19 = vld [vmem:[#allocation8 + $0x3b8] sm:$0xff] }
 0x19e   :  { %1766 = vmatpush1.msra.mxu1 %v1384_v20  ;;  %1825 = vmatpush1.msra.mxu0 %v1026_v21  ;;  %v1468_v20 = vld [vmem:[#allocation8 + $0xee0] sm:$0xff]  ;;  %v1110_v21 = vld [vmem:[#allocation8 + $0x3b0] sm:$0xff] }
 0x19f   :  { %1767 = vmatprep.subr.mxu1 %v1381_v22  ;;  %1826 = vmatprep.subr.mxu0 %v1023_v27  ;;  %v1465_v22 = vld [vmem:[#allocation8 + $0xec8] sm:$0xff]  ;;  %v1107_v27 = vld [vmem:[#allocation8 + $0x398] sm:$0xff] }
 0x1a0   :  { %1768 = vmatpush1.msra.mxu1 %v1380_v3  ;;  %1827 = vmatpush1.msra.mxu0 %v1022_v23  ;;  %v1464_v3 = vld [vmem:[#allocation8 + $0xec0] sm:$0xff]  ;;  %v1106_v23 = vld [vmem:[#allocation8 + $0x390] sm:$0xff] }
 0x1a1   :  { %1769 = vmatprep.subr.mxu1 %v1377_v24  ;;  %1828 = vmatprep.subr.mxu0 %v1019_v25  ;;  %v1461_v24 = vld [vmem:[#allocation8 + $0xea8] sm:$0xff]  ;;  %v1103_v25 = vld [vmem:[#allocation8 + $0x378] sm:$0xff] }
 0x1a2   :  { %1770 = vmatpush1.msra.mxu1 %v1376_v26  ;;  %1829 = vmatpush1.msra.mxu0 %v1018_v29  ;;  %v962_v26 = vsub.s32 6, %v2570_v28  ;;  %v1460_v29 = vld [vmem:[#allocation8 + $0xea0] sm:$0xff] }
 0x1a3   :  { %1771 = vmatprep.subr.mxu1 %v1501_v35  ;;  %1830 = vmatprep.subr.mxu0 %v1015_v36  ;;  %v1102_v35 = vld [vmem:[#allocation8 + $0x370] sm:$0xff]  ;;  %v1457_v36 = vld [vmem:[#allocation8 + $0xe88] sm:$0xff] }
 0x1a4   :  { %1772 = vmatpush2.msra.mxu1 %v1500_v37  ;;  %1831 = vmatpush1.msra.mxu0 %v1014_v38  ;;  %v1099_v37 = vld [vmem:[#allocation8 + $0x358] sm:$0xff]  ;;  %v1456_v38 = vld [vmem:[#allocation8 + $0xe80] sm:$0xff] }
 0x1a5   :  { %1773 = vmatprep.subr.mxu1 %v1497_v45  ;;  %1832 = vmatprep.subr.mxu0 %v1011_v46  ;;  %v1098_v45 = vld [vmem:[#allocation8 + $0x350] sm:$0xff]  ;;  %v1453_v46 = vld [vmem:[#allocation8 + $0xe68] sm:$0xff] }
 0x1a6   :  { %1774 = vmatpush2.msra.mxu1 %v1496_v47  ;;  %1833 = vmatpush1.msra.mxu0 %v1010_v48  ;;  %v1095_v47 = vld [vmem:[#allocation8 + $0x338] sm:$0xff]  ;;  %v930_v48 = vadd.f32 %v2638_v56, %v2604_v34  ;;  %v1086_v34 = vld [vmem:[#allocation8 + $0x2f0] sm:$0xff]  ;;  %v1441_v56 = vld [vmem:[#allocation8 + $0xe08] sm:$0xff] }
 0x1a7   :  { %1775 = vmatprep.subr.mxu1 %v1493_v49  ;;  %1834 = vmatprep.subr.mxu0 %v1007_v50  ;;  %v963_v49 = vrot.slane %v2575_v31, %v962_v26  ;;  %v1452_v50 = vld [vmem:[#allocation8 + $0xe60] sm:$0xff]  ;;  %v1058_v26 = vld [vmem:[#allocation8 + $0x210] sm:$0xff] }
 0x1a8   :  { %1776 = vmatpush2.msra.mxu1 %v1492_v51  ;;  %1835 = vmatpush1.msra.mxu0 %v1006_v52  ;;  %v1094_v51 = vld [vmem:[#allocation8 + $0x330] sm:$0xff]  ;;  %v1449_v52 = vld [vmem:[#allocation8 + $0xe48] sm:$0xff]  ;;  %v1444_v31 = vld [vmem:[#allocation8 + $0xe20] sm:$0xff] }
 0x1a9   :  { %1777 = vmatprep.subr.mxu1 %v1489_v54  ;;  %1836 = vmatprep.subr.mxu0 %v1003_v55  ;;  %v1091_v54 = vld [vmem:[#allocation8 + $0x318] sm:$0xff]  ;;  %v1448_v55 = vld [vmem:[#allocation8 + $0xe40] sm:$0xff] }
 0x1aa   :  { %1778 = vmatpush2.msra.mxu1 %v1488_v57  ;;  %1837 = vmatpush1.msra.mxu0 %v1002_v59  ;;  %v1090_v57 = vld [vmem:[#allocation8 + $0x310] sm:$0xff]  ;;  %v1445_v59 = vld [vmem:[#allocation8 + $0xe28] sm:$0xff] }
 0x1ab   :  { %1779 = vmatprep.subr.mxu1 %v1485_v61  ;;  %1838 = vmatprep.subr.mxu0 %v999_v62  ;;  %v1087_v61 = vld [vmem:[#allocation8 + $0x2f8] sm:$0xff]  ;;  %v2651_v62 = vadd.f32 %v963_v49, %v930_v48  ;;  %v1306_v48 = vld [vmem:[#allocation8 + $0x9d0] sm:$0xff] }
 0x1ac   :  { %1780 = vmatpush2.msra.mxu1 %v1484_v41  ;;  %1839 = vmatpush1.msra.mxu0 %v998_v42  ;;  %v1083_v41 = vld [vmem:[#allocation8 + $0x2d8] sm:$0xff]  ;;  %v1440_v42 = vld [vmem:[#allocation8 + $0xe00] sm:$0xff] }
 0x1ad   :  { %1781 = vmatprep.subr.mxu1 %v1481_v63  ;;  %1840 = vmatprep.subr.mxu0 %v995_v2  ;;  %v1082_v63 = vld [vmem:[#allocation8 + $0x2d0] sm:$0xff]  ;;  %v1079_v2 = vld [vmem:[#allocation8 + $0x2b8] sm:$0xff] }
 0x1ae   :  { %1782 = vmatpush2.msra.mxu1 %v1480_v5  ;;  %1841 = vmatpush1.msra.mxu0 %v994_v6  ;;  %v990_v5 = vmax.f32 %v2651_v62, 0.0  ;;  %v1183_v6 = vld [vmem:[#allocation8 + $0x5f8] sm:$0xff] }
 0x1af   :  { %1783 = vmatprep.subr.mxu1 %v1477_v7  ;;  %1842 = vmatprep.subr.mxu0 %v1119_v8  ;;  %v1078_v7 = vld [vmem:[#allocation8 + $0x2b0] sm:$0xff]  ;;  %v1151_v49 = vld [vmem:[#allocation8 + $0x4f8] sm:$0xff] }
 0x1b0   :  { %1784 = vmatpush2.msra.mxu1 %v1476_v9  ;;  %1843 = vmatpush2.msra.mxu0 %v1118_v11  ;;  %v1182_v8 = vld [vmem:[#allocation8 + $0x5f0] sm:$0xff]  ;;  %v1075_v9 = vld [vmem:[#allocation8 + $0x298] sm:$0xff] }
 0x1b1   :  { %1785 = vmatprep.subr.mxu1 %v1473_v13  ;;  %1844 = vmatprep.subr.mxu0 %v1115_v14  ;;  %v1179_v11 = vld [vmem:[#allocation8 + $0x5d8] sm:$0xff]  ;;  %v1074_v13 = vld [vmem:[#allocation8 + $0x290] sm:$0xff] }
 0x1b2   :  { %1786 = vmatpush2.msra.mxu1 %v1472_v16  ;;  %1845 = vmatpush2.msra.mxu0 %v1114_v53  ;;  %v1178_v14 = vld [vmem:[#allocation8 + $0x5d0] sm:$0xff]  ;;  %v1071_v16 = vld [vmem:[#allocation8 + $0x278] sm:$0xff] }
 0x1b3   :  { %1787 = vmatprep.subr.mxu1 %v1469_v18  ;;  %1846 = vmatprep.subr.mxu0 %v1111_v19  ;;  %v1175_v53 = vld [vmem:[#allocation8 + $0x5b8] sm:$0xff]  ;;  %v1070_v18 = vld [vmem:[#allocation8 + $0x270] sm:$0xff] }
 0x1b4   :  { %1788 = vmatpush2.msra.mxu1 %v1468_v20  ;;  %1847 = vmatpush2.msra.mxu0 %v1110_v21  ;;  %v1174_v19 = vld [vmem:[#allocation8 + $0x5b0] sm:$0xff]  ;;  %v1067_v20 = vld [vmem:[#allocation8 + $0x258] sm:$0xff] }
 0x1b5   :  { %1789 = vmatprep.subr.mxu1 %v1465_v22  ;;  %1848 = vmatprep.subr.mxu0 %v1107_v27  ;;  %v1171_v21 = vld [vmem:[#allocation8 + $0x598] sm:$0xff]  ;;  %v1066_v22 = vld [vmem:[#allocation8 + $0x250] sm:$0xff] }
 0x1b6   :  { %1790 = vmatpush2.msra.mxu1 %v1464_v3  ;;  %1849 = vmatpush2.msra.mxu0 %v1106_v23  ;;  %v1170_v27 = vld [vmem:[#allocation8 + $0x590] sm:$0xff]  ;;  %v1063_v3 = vld [vmem:[#allocation8 + $0x238] sm:$0xff] }
 0x1b7   :  { %1791 = vmatprep.subr.mxu1 %v1461_v24  ;;  %1850 = vmatprep.subr.mxu0 %v1103_v25  ;;  %v1167_v23 = vld [vmem:[#allocation8 + $0x578] sm:$0xff] }
 0x1b8   :  { %1792 = vmatpush2.msra.mxu1 %v1460_v29  ;;  %1851 = vmatpush2.msra.mxu0 %v1102_v35  ;;  %v1059_v24 = vld [vmem:[#allocation8 + $0x218] sm:$0xff]  ;;  %v1162_v29 = vld [vmem:[#allocation8 + $0x550] sm:$0xff] }
 0x1b9   :  { %1793 = vmatprep.subr.mxu1 %v1457_v36  ;;  %1852 = vmatprep.subr.mxu0 %v1099_v37  ;;  %v1163_v25 = vld [vmem:[#allocation8 + $0x558] sm:$0xff]  ;;  %v1158_v37 = vld [vmem:[#allocation8 + $0x530] sm:$0xff] }
 0x1ba   :  { %1794 = vmatpush2.msra.mxu1 %v1456_v38  ;;  %1853 = vmatpush2.msra.mxu0 %v1098_v45  ;;  %v1159_v35 = vld [vmem:[#allocation8 + $0x538] sm:$0xff]  ;;  %v1310_v38 = vld [vmem:[#allocation8 + $0x9f0] sm:$0xff] }
 0x1bb   :  { %1795 = vmatprep.subr.mxu1 %v1453_v46  ;;  %1854 = vmatprep.subr.mxu0 %v1095_v47  ;;  %v1311_v36 = vld [vmem:[#allocation8 + $0x9f8] sm:$0xff]  ;;  %v1154_v47 = vld [vmem:[#allocation8 + $0x510] sm:$0xff] }
 0x1bc   :  { %1796 = vmatpush2.msra.mxu1 %v1452_v50  ;;  %1855 = vmatpush2.msra.mxu0 %v1094_v51  ;;  %v1155_v45 = vld [vmem:[#allocation8 + $0x518] sm:$0xff]  ;;  %v1150_v51 = vld [vmem:[#allocation8 + $0x4f0] sm:$0xff] }
 0x1bd   :  { %1797 = vmatprep.subr.mxu1 %v1449_v52  ;;  %1856 = vmatprep.subr.mxu0 %v1091_v54  ;;  %v1307_v46 = vld [vmem:[#allocation8 + $0x9d8] sm:$0xff]  ;;  %v1302_v52 = vld [vmem:[#allocation8 + $0x9b0] sm:$0xff] }
 0x1be   :  { %1798 = vmatpush2.msra.mxu1 %v1448_v55  ;;  %1857 = vmatpush2.msra.mxu0 %v1090_v57  ;;  %v1303_v50 = vld [vmem:[#allocation8 + $0x9b8] sm:$0xff]  ;;  %v1146_v54 = vld [vmem:[#allocation8 + $0x4d0] sm:$0xff] }
 0x1bf   :  { %1799 = vmatprep.subr.mxu1 %v1445_v59  ;;  %1858 = vmatprep.subr.mxu0 %v1087_v61  ;;  %v1298_v55 = vld [vmem:[#allocation8 + $0x990] sm:$0xff]  ;;  %v1143_v57 = vld [vmem:[#allocation8 + $0x4b8] sm:$0xff] }
 0x1c0   :  { %1800 = vmatpush2.msra.mxu1 %v1444_v31  ;;  %1859 = vmatpush2.msra.mxu0 %v1086_v34  ;;  %v1295_v59 = vld [vmem:[#allocation8 + $0x978] sm:$0xff]  ;;  %v1138_v34 = vld [vmem:[#allocation8 + $0x490] sm:$0xff] }
 0x1c1   :  { %1801 = vmatprep.subr.mxu1 %v1441_v56  ;;  %1860 = vmatprep.subr.mxu0 %v1083_v41  ;;  %v1139_v61 = vld [vmem:[#allocation8 + $0x498] sm:$0xff]  ;;  %v1290_v56 = vld [vmem:[#allocation8 + $0x950] sm:$0xff] }
 0x1c2   :  { %1802 = vmatpush2.msra.mxu1 %v1440_v42  ;;  %1861 = vmatpush2.msra.mxu0 %v1082_v63  ;;  %v1291_v31 = vld [vmem:[#allocation8 + $0x958] sm:$0xff]  ;;  %v1134_v63 = vld [vmem:[#allocation8 + $0x470] sm:$0xff] }
 0x1c3   :  { %1804 = vmatmul.mubr.f32.vlgmr.msra.gmra.mxu1 %v990_v5  ;;  %1862 = vmatprep.subr.mxu0 %v1079_v2  ;;  %v1135_v41 = vld [vmem:[#allocation8 + $0x478] sm:$0xff]  ;;  %v1286_v2 = vld [vmem:[#allocation8 + $0x930] sm:$0xff] }
 0x1c4   :  { %1881 = vmatprep.subr.mxu1 %v1183_v6  ;;  %1863 = vmatpush2.msra.mxu0 %v1078_v7  ;;  %v1287_v42 = vld [vmem:[#allocation8 + $0x938] sm:$0xff] }
 0x1c5   :  { %1882 = vmatpush1.msra.mxu1 %v1182_v8  ;;  %1945 = vmatprep.mubr.f32.mxu1 %v987_v1  ;;  %v1166_v1 = vld [vmem:[#allocation8 + $0x570] sm:$0xff]  ;;  %v1131_v6 = vld [vmem:[#allocation8 + $0x458] sm:$0xff] }
 0x1c6   :  { %1864 = vmatprep.subr.mxu0 %v1075_v9  ;;  %1883 = vmatprep.subr.mxu1 %v1179_v11  ;;  %v1283_v7 = vld [vmem:[#allocation8 + $0x918] sm:$0xff]  ;;  %v1130_v8 = vld [vmem:[#allocation8 + $0x450] sm:$0xff] }
 0x1c7   :  { %1865 = vmatpush2.msra.mxu0 %v1074_v13  ;;  %1884 = vmatpush1.msra.mxu1 %v1178_v14  ;;  %v1282_v9 = vld [vmem:[#allocation8 + $0x910] sm:$0xff]  ;;  %v1127_v11 = vld [vmem:[#allocation8 + $0x438] sm:$0xff] }
 0x1c8   :  { %1866 = vmatprep.subr.mxu0 %v1071_v16  ;;  %1885 = vmatprep.subr.mxu1 %v1175_v53  ;;  %v1279_v13 = vld [vmem:[#allocation8 + $0x8f8] sm:$0xff]  ;;  %v1126_v14 = vld [vmem:[#allocation8 + $0x430] sm:$0xff] }
 0x1c9   :  { %1867 = vmatpush2.msra.mxu0 %v1070_v18  ;;  %1886 = vmatpush1.msra.mxu1 %v1174_v19  ;;  %v1278_v16 = vld [vmem:[#allocation8 + $0x8f0] sm:$0xff]  ;;  %v1123_v53 = vld [vmem:[#allocation8 + $0x418] sm:$0xff] }
 0x1ca   :  { %1868 = vmatprep.subr.mxu0 %v1067_v20  ;;  %1887 = vmatprep.subr.mxu1 %v1171_v21  ;;  %v1275_v18 = vld [vmem:[#allocation8 + $0x8d8] sm:$0xff]  ;;  %v1122_v19 = vld [vmem:[#allocation8 + $0x410] sm:$0xff] }
 0x1cb   :  { %1869 = vmatpush2.msra.mxu0 %v1066_v22  ;;  %1888 = vmatpush1.msra.mxu1 %v1170_v27  ;;  %v1274_v20 = vld [vmem:[#allocation8 + $0x8d0] sm:$0xff]  ;;  %v1247_v21 = vld [vmem:[#allocation8 + $0x7f8] sm:$0xff] }
 0x1cc   :  { %1870 = vmatprep.subr.mxu0 %v1063_v3  ;;  %1889 = vmatprep.subr.mxu1 %v1167_v23  ;;  %v1271_v22 = vld [vmem:[#allocation8 + $0x8b8] sm:$0xff]  ;;  %v1246_v27 = vld [vmem:[#allocation8 + $0x7f0] sm:$0xff] }
 0x1cd   :  { %1871 = vmatpush2.msra.mxu0 %v1062_v60  ;;  %1890 = vmatpush1.msra.mxu1 %v1166_v1  ;;  %v1270_v3 = vld [vmem:[#allocation8 + $0x8b0] sm:$0xff]  ;;  %v1243_v23 = vld [vmem:[#allocation8 + $0x7d8] sm:$0xff] }
 0x1ce   :  { %1872 = vmatprep.subr.mxu0 %v1059_v24  ;;  %1891 = vmatprep.subr.mxu1 %v1163_v25  ;;  %v1267_v60 = vld [vmem:[#allocation8 + $0x898] sm:$0xff]  ;;  %v1242_v1 = vld [vmem:[#allocation8 + $0x7d0] sm:$0xff] }
 0x1cf   :  { %1873 = vmatpush2.msra.mxu0 %v1058_v26  ;;  %1892 = vmatpush1.msra.mxu1 %v1162_v29  ;;  %v1266_v24 = vld [vmem:[#allocation8 + $0x890] sm:$0xff]  ;;  %v1239_v25 = vld [vmem:[#allocation8 + $0x7b8] sm:$0xff] }
 0x1d0   :  { %1875 = vmatmul.mubr.f32.vlgmr.msra.gmra.mxu0 %v984_v43  ;;  %1893 = vmatprep.subr.mxu1 %v1159_v35  ;;  %v1299_v43 = vld [vmem:[#allocation8 + $0x998] sm:$0xff]  ;;  %v1238_v29 = vld [vmem:[#allocation8 + $0x7b0] sm:$0xff] }
 0x1d1   :  { %1952 = vmatprep.subr.mxu0 %v1311_v36  ;;  %1894 = vmatpush1.msra.mxu1 %v1158_v37  ;;  %v1263_v26 = vld [vmem:[#allocation8 + $0x878] sm:$0xff]  ;;  %v1262_v35 = vld [vmem:[#allocation8 + $0x870] sm:$0xff] }
 0x1d2   :  { %1953 = vmatpush1.msra.mxu0 %v1310_v38  ;;  %2016 = vmatprep.mubr.f32.mxu0 %v989_v15  ;;  %v1294_v15 = vld [vmem:[#allocation8 + $0x970] sm:$0xff]  ;;  %v1235_v36 = vld [vmem:[#allocation8 + $0x798] sm:$0xff] }
 0x1d3   :  { %1895 = vmatprep.subr.mxu1 %v1155_v45  ;;  %1954 = vmatprep.subr.mxu0 %v1307_v46  ;;  %v1259_v37 = vld [vmem:[#allocation8 + $0x858] sm:$0xff]  ;;  %v1234_v38 = vld [vmem:[#allocation8 + $0x790] sm:$0xff] }
 0x1d4   :  { %1896 = vmatpush1.msra.mxu1 %v1154_v47  ;;  %1955 = vmatpush1.msra.mxu0 %v1306_v48  ;;  %v1258_v45 = vld [vmem:[#allocation8 + $0x850] sm:$0xff]  ;;  %v1231_v46 = vld [vmem:[#allocation8 + $0x778] sm:$0xff] }
 0x1d5   :  { %1897 = vmatprep.subr.mxu1 %v1151_v49  ;;  %1956 = vmatprep.subr.mxu0 %v1303_v50  ;;  %v1255_v47 = vld [vmem:[#allocation8 + $0x838] sm:$0xff]  ;;  %v1230_v48 = vld [vmem:[#allocation8 + $0x770] sm:$0xff] }
 0x1d6   :  { %1898 = vmatpush1.msra.mxu1 %v1150_v51  ;;  %1957 = vmatpush1.msra.mxu0 %v1302_v52  ;;  %v1254_v49 = vld [vmem:[#allocation8 + $0x830] sm:$0xff]  ;;  %v1227_v50 = vld [vmem:[#allocation8 + $0x758] sm:$0xff] }
 0x1d7   :  { %1899 = vmatprep.subr.mxu1 %v1147_v40  ;;  %1958 = vmatprep.subr.mxu0 %v1299_v43  ;;  %v1251_v51 = vld [vmem:[#allocation8 + $0x818] sm:$0xff]  ;;  %v1226_v52 = vld [vmem:[#allocation8 + $0x750] sm:$0xff] }
 0x1d8   :  { %1900 = vmatpush1.msra.mxu1 %v1146_v54  ;;  %1959 = vmatpush1.msra.mxu0 %v1298_v55  ;;  %v1250_v40 = vld [vmem:[#allocation8 + $0x810] sm:$0xff]  ;;  %v1223_v43 = vld [vmem:[#allocation8 + $0x738] sm:$0xff] }
 0x1d9   :  { %1901 = vmatprep.subr.mxu1 %v1143_v57  ;;  %1960 = vmatprep.subr.mxu0 %v1295_v59  ;;  %v1375_v54 = vld [vmem:[#allocation8 + $0xbf8] sm:$0xff]  ;;  %v1222_v55 = vld [vmem:[#allocation8 + $0x730] sm:$0xff] }
 0x1da   :  { %1902 = vmatpush1.msra.mxu1 %v1142_v12  ;;  %1961 = vmatpush1.msra.mxu0 %v1294_v15  ;;  %v1374_v57 = vld [vmem:[#allocation8 + $0xbf0] sm:$0xff]  ;;  %v1219_v59 = vld [vmem:[#allocation8 + $0x718] sm:$0xff] }
 0x1db   :  { %1903 = vmatprep.subr.mxu1 %v1139_v61  ;;  %1962 = vmatprep.subr.mxu0 %v1291_v31  ;;  %v1371_v12 = vld [vmem:[#allocation8 + $0xbd8] sm:$0xff]  ;;  %v1218_v15 = vld [vmem:[#allocation8 + $0x710] sm:$0xff] }
 0x1dc   :  { %1904 = vmatpush1.msra.mxu1 %v1138_v34  ;;  %1963 = vmatpush1.msra.mxu0 %v1290_v56  ;;  %v1370_v61 = vld [vmem:[#allocation8 + $0xbd0] sm:$0xff]  ;;  %v1215_v31 = vld [vmem:[#allocation8 + $0x6f8] sm:$0xff] }
 0x1dd   :  { %1905 = vmatprep.subr.mxu1 %v1135_v41  ;;  %1964 = vmatprep.subr.mxu0 %v1287_v42  ;;  %v1367_v34 = vld [vmem:[#allocation8 + $0xbb8] sm:$0xff]  ;;  %v1214_v56 = vld [vmem:[#allocation8 + $0x6f0] sm:$0xff] }
 0x1de   :  { %1906 = vmatpush1.msra.mxu1 %v1134_v63  ;;  %1965 = vmatpush1.msra.mxu0 %v1286_v2  ;;  %v1366_v41 = vld [vmem:[#allocation8 + $0xbb0] sm:$0xff]  ;;  %v1211_v42 = vld [vmem:[#allocation8 + $0x6d8] sm:$0xff] }
 0x1df   :  { %1907 = vmatprep.subr.mxu1 %v1131_v6  ;;  %1966 = vmatprep.subr.mxu0 %v1283_v7  ;;  %v1363_v63 = vld [vmem:[#allocation8 + $0xb98] sm:$0xff]  ;;  %v1210_v2 = vld [vmem:[#allocation8 + $0x6d0] sm:$0xff] }
 0x1e0   :  { %1908 = vmatpush1.msra.mxu1 %v1130_v8  ;;  %1967 = vmatpush1.msra.mxu0 %v1282_v9  ;;  %v1362_v6 = vld [vmem:[#allocation8 + $0xb90] sm:$0xff]  ;;  %v1207_v7 = vld [vmem:[#allocation8 + $0x6b8] sm:$0xff] }
 0x1e1   :  { %1909 = vmatprep.subr.mxu1 %v1127_v11  ;;  %1968 = vmatprep.subr.mxu0 %v1279_v13  ;;  %v1359_v8 = vld [vmem:[#allocation8 + $0xb78] sm:$0xff]  ;;  %v1206_v9 = vld [vmem:[#allocation8 + $0x6b0] sm:$0xff] }
 0x1e2   :  { %1910 = vmatpush1.msra.mxu1 %v1126_v14  ;;  %1969 = vmatpush1.msra.mxu0 %v1278_v16  ;;  %v1358_v11 = vld [vmem:[#allocation8 + $0xb70] sm:$0xff]  ;;  %v1203_v13 = vld [vmem:[#allocation8 + $0x698] sm:$0xff] }
 0x1e3   :  { %1911 = vmatprep.subr.mxu1 %v1123_v53  ;;  %1970 = vmatprep.subr.mxu0 %v1275_v18  ;;  %v1355_v14 = vld [vmem:[#allocation8 + $0xb58] sm:$0xff]  ;;  %v1202_v16 = vld [vmem:[#allocation8 + $0x690] sm:$0xff] }
 0x1e4   :  { %1912 = vmatpush1.msra.mxu1 %v1122_v19  ;;  %1971 = vmatpush1.msra.mxu0 %v1274_v20  ;;  %v1354_v53 = vld [vmem:[#allocation8 + $0xb50] sm:$0xff]  ;;  %v1199_v18 = vld [vmem:[#allocation8 + $0x678] sm:$0xff] }
 0x1e5   :  { %1913 = vmatprep.subr.mxu1 %v1247_v21  ;;  %1972 = vmatprep.subr.mxu0 %v1271_v22  ;;  %v1351_v19 = vld [vmem:[#allocation8 + $0xb38] sm:$0xff]  ;;  %v1198_v20 = vld [vmem:[#allocation8 + $0x670] sm:$0xff] }
 0x1e6   :  { %1914 = vmatpush2.msra.mxu1 %v1246_v27  ;;  %1973 = vmatpush1.msra.mxu0 %v1270_v3  ;;  %v1350_v21 = vld [vmem:[#allocation8 + $0xb30] sm:$0xff]  ;;  %v1195_v22 = vld [vmem:[#allocation8 + $0x658] sm:$0xff] }
 0x1e7   :  { %1915 = vmatprep.subr.mxu1 %v1243_v23  ;;  %1974 = vmatprep.subr.mxu0 %v1267_v60  ;;  %v1347_v27 = vld [vmem:[#allocation8 + $0xb18] sm:$0xff]  ;;  %v1194_v3 = vld [vmem:[#allocation8 + $0x650] sm:$0xff] }
 0x1e8   :  { %1916 = vmatpush2.msra.mxu1 %v1242_v1  ;;  %1975 = vmatpush1.msra.mxu0 %v1266_v24  ;;  %v1346_v23 = vld [vmem:[#allocation8 + $0xb10] sm:$0xff]  ;;  %v1191_v60 = vld [vmem:[#allocation8 + $0x638] sm:$0xff] }
 0x1e9   :  { %1917 = vmatprep.subr.mxu1 %v1239_v25  ;;  %1976 = vmatprep.subr.mxu0 %v1263_v26  ;;  %v1343_v1 = vld [vmem:[#allocation8 + $0xaf8] sm:$0xff]  ;;  %v1190_v24 = vld [vmem:[#allocation8 + $0x630] sm:$0xff] }
 0x1ea   :  { %1918 = vmatpush2.msra.mxu1 %v1238_v29  ;;  %1977 = vmatpush1.msra.mxu0 %v1262_v35  ;;  %v1342_v25 = vld [vmem:[#allocation8 + $0xaf0] sm:$0xff]  ;;  %v1187_v26 = vld [vmem:[#allocation8 + $0x618] sm:$0xff] }
 0x1eb   :  { %1919 = vmatprep.subr.mxu1 %v1235_v36  ;;  %1978 = vmatprep.subr.mxu0 %v1259_v37  ;;  %v1339_v29 = vld [vmem:[#allocation8 + $0xad8] sm:$0xff]  ;;  %v1186_v35 = vld [vmem:[#allocation8 + $0x610] sm:$0xff] }
 0x1ec   :  { %1920 = vmatpush2.msra.mxu1 %v1234_v38  ;;  %1979 = vmatpush1.msra.mxu0 %v1258_v45  ;;  %v1338_v36 = vld [vmem:[#allocation8 + $0xad0] sm:$0xff]  ;;  %v1335_v37 = vld [vmem:[#allocation8 + $0xab8] sm:$0xff] }
 0x1ed   :  { %1921 = vmatprep.subr.mxu1 %v1231_v46  ;;  %1980 = vmatprep.subr.mxu0 %v1255_v47  ;;  %v1439_v38 = vld [vmem:[#allocation8 + $0xdf8] sm:$0xff]  ;;  %v1334_v45 = vld [vmem:[#allocation8 + $0xab0] sm:$0xff] }
 0x1ee   :  { %1922 = vmatpush2.msra.mxu1 %v1230_v48  ;;  %1981 = vmatpush1.msra.mxu0 %v1254_v49  ;;  %v1438_v46 = vld [vmem:[#allocation8 + $0xdf0] sm:$0xff]  ;;  %v1331_v47 = vld [vmem:[#allocation8 + $0xa98] sm:$0xff] }
 0x1ef   :  { %1923 = vmatprep.subr.mxu1 %v1227_v50  ;;  %1982 = vmatprep.subr.mxu0 %v1251_v51  ;;  %v1435_v48 = vld [vmem:[#allocation8 + $0xdd8] sm:$0xff]  ;;  %v1330_v49 = vld [vmem:[#allocation8 + $0xa90] sm:$0xff] }
 0x1f0   :  { %1924 = vmatpush2.msra.mxu1 %v1226_v52  ;;  %1983 = vmatpush1.msra.mxu0 %v1250_v40  ;;  %v1434_v50 = vld [vmem:[#allocation8 + $0xdd0] sm:$0xff]  ;;  %v1327_v51 = vld [vmem:[#allocation8 + $0xa78] sm:$0xff] }
 0x1f1   :  { %1925 = vmatprep.subr.mxu1 %v1223_v43  ;;  %1984 = vmatprep.subr.mxu0 %v1375_v54  ;;  %v1431_v52 = vld [vmem:[#allocation8 + $0xdb8] sm:$0xff]  ;;  %v1326_v40 = vld [vmem:[#allocation8 + $0xa70] sm:$0xff] }
 0x1f2   :  { %1926 = vmatpush2.msra.mxu1 %v1222_v55  ;;  %1985 = vmatpush2.msra.mxu0 %v1374_v57  ;;  %v1430_v43 = vld [vmem:[#allocation8 + $0xdb0] sm:$0xff]  ;;  %v1319_v57 = vld [vmem:[#allocation8 + $0xa38] sm:$0xff] }
 0x1f3   :  { %1927 = vmatprep.subr.mxu1 %v1219_v59  ;;  %1986 = vmatprep.subr.mxu0 %v1371_v12  ;;  %v1322_v54 = vld [vmem:[#allocation8 + $0xa50] sm:$0xff]  ;;  %v1423_v59 = vld [vmem:[#allocation8 + $0xd78] sm:$0xff] }
 0x1f4   :  { %1928 = vmatpush2.msra.mxu1 %v1218_v15  ;;  %1987 = vmatpush2.msra.mxu0 %v1370_v61  ;;  %v1426_v55 = vld [vmem:[#allocation8 + $0xd90] sm:$0xff]  ;;  %v1315_v12 = vld [vmem:[#allocation8 + $0xa18] sm:$0xff] }
 0x1f5   :  { %1929 = vmatprep.subr.mxu1 %v1215_v31  ;;  %1988 = vmatprep.subr.mxu0 %v1367_v34  ;;  %v1419_v15 = vld [vmem:[#allocation8 + $0xd58] sm:$0xff]  ;;  %v1314_v61 = vld [vmem:[#allocation8 + $0xa10] sm:$0xff] }
 0x1f6   :  { %1930 = vmatpush2.msra.mxu1 %v1214_v56  ;;  %1989 = vmatpush2.msra.mxu0 %v1366_v41  ;;  %v1418_v31 = vld [vmem:[#allocation8 + $0xd50] sm:$0xff]  ;;  %v1415_v34 = vld [vmem:[#allocation8 + $0xd38] sm:$0xff] }
 0x1f7   :  { %1931 = vmatprep.subr.mxu1 %v1211_v42  ;;  %1990 = vmatprep.subr.mxu0 %v1363_v63  ;;  %v1414_v56 = vld [vmem:[#allocation8 + $0xd30] sm:$0xff]  ;;  %v1411_v41 = vld [vmem:[#allocation8 + $0xd18] sm:$0xff] }
 0x1f8   :  { %1932 = vmatpush2.msra.mxu1 %v1210_v2  ;;  %1991 = vmatpush2.msra.mxu0 %v1362_v6  ;;  %v1410_v42 = vld [vmem:[#allocation8 + $0xd10] sm:$0xff]  ;;  %v1407_v63 = vld [vmem:[#allocation8 + $0xcf8] sm:$0xff] }
 0x1f9   :  { %1933 = vmatprep.subr.mxu1 %v1207_v7  ;;  %1992 = vmatprep.subr.mxu0 %v1359_v8  ;;  %v1406_v2 = vld [vmem:[#allocation8 + $0xcf0] sm:$0xff]  ;;  %v1403_v6 = vld [vmem:[#allocation8 + $0xcd8] sm:$0xff] }
 0x1fa   :  { %1934 = vmatpush2.msra.mxu1 %v1206_v9  ;;  %1993 = vmatpush2.msra.mxu0 %v1358_v11  ;;  %v1402_v7 = vld [vmem:[#allocation8 + $0xcd0] sm:$0xff]  ;;  %v1399_v8 = vld [vmem:[#allocation8 + $0xcb8] sm:$0xff] }
 0x1fb   :  { %1935 = vmatprep.subr.mxu1 %v1203_v13  ;;  %1994 = vmatprep.subr.mxu0 %v1355_v14  ;;  %v1398_v9 = vld [vmem:[#allocation8 + $0xcb0] sm:$0xff]  ;;  %v1395_v11 = vld [vmem:[#allocation8 + $0xc98] sm:$0xff] }
 0x1fc   :  { %1936 = vmatpush2.msra.mxu1 %v1202_v16  ;;  %1995 = vmatpush2.msra.mxu0 %v1354_v53  ;;  %v1394_v13 = vld [vmem:[#allocation8 + $0xc90] sm:$0xff]  ;;  %v1387_v14 = vld [vmem:[#allocation8 + $0xc58] sm:$0xff] }
 0x1fd   :  { %1937 = vmatprep.subr.mxu1 %v1199_v18  ;;  %1996 = vmatprep.subr.mxu0 %v1351_v19  ;;  %v1386_v16 = vld [vmem:[#allocation8 + $0xc50] sm:$0xff]  ;;  %v1383_v53 = vld [vmem:[#allocation8 + $0xc38] sm:$0xff] }
 0x1fe   :  { %1938 = vmatpush2.msra.mxu1 %v1198_v20  ;;  %1997 = vmatpush2.msra.mxu0 %v1350_v21  ;;  %v1382_v18 = vld [vmem:[#allocation8 + $0xc30] sm:$0xff]  ;;  %v1379_v19 = vld [vmem:[#allocation8 + $0xc18] sm:$0xff] }
 0x1ff   :  { %1939 = vmatprep.subr.mxu1 %v1195_v22  ;;  %1998 = vmatprep.subr.mxu0 %v1347_v27  ;;  %v1378_v20 = vld [vmem:[#allocation8 + $0xc10] sm:$0xff]  ;;  %v1503_v21 = vld [vmem:[#allocation8 + $0xff8] sm:$0xff] }
 0x200   :  { %1940 = vmatpush2.msra.mxu1 %v1194_v3  ;;  %1999 = vmatpush2.msra.mxu0 %v1346_v23  ;;  %v1502_v22 = vld [vmem:[#allocation8 + $0xff0] sm:$0xff]  ;;  %v1499_v27 = vld [vmem:[#allocation8 + $0xfd8] sm:$0xff] }
 0x201   :  { %1941 = vmatprep.subr.mxu1 %v1191_v60  ;;  %2000 = vmatprep.subr.mxu0 %v1343_v1  ;;  %v1498_v3 = vld [vmem:[#allocation8 + $0xfd0] sm:$0xff]  ;;  %v1495_v23 = vld [vmem:[#allocation8 + $0xfb8] sm:$0xff] }
 0x202   :  { %1942 = vmatpush2.msra.mxu1 %v1190_v24  ;;  %2001 = vmatpush2.msra.mxu0 %v1342_v25  ;;  %v1494_v60 = vld [vmem:[#allocation8 + $0xfb0] sm:$0xff]  ;;  %v1491_v1 = vld [vmem:[#allocation8 + $0xf98] sm:$0xff] }
 0x203   :  { %1943 = vmatprep.subr.mxu1 %v1187_v26  ;;  %2002 = vmatprep.subr.mxu0 %v1339_v29  ;;  %v1490_v24 = vld [vmem:[#allocation8 + $0xf90] sm:$0xff]  ;;  %v1487_v25 = vld [vmem:[#allocation8 + $0xf78] sm:$0xff] }
 0x204   :  { %1944 = vmatpush2.msra.mxu1 %v1186_v35  ;;  %2003 = vmatpush2.msra.mxu0 %v1338_v36  ;;  %v1486_v26 = vld [vmem:[#allocation8 + $0xf70] sm:$0xff]  ;;  %v1483_v29 = vld [vmem:[#allocation8 + $0xf58] sm:$0xff] }
 0x205   :  { %1946 = vmatmul.mubr.f32.vlgmr.msra.gmra.mxu1 %v986_v4  ;;  %2004 = vmatprep.subr.mxu0 %v1335_v37  ;;  %v1427_v4 = vld [vmem:[#allocation8 + $0xd98] sm:$0xff]  ;;  %v1482_v35 = vld [vmem:[#allocation8 + $0xf50] sm:$0xff] }
 0x206   :  { %2023 = vmatprep.subr.mxu1 %v1439_v38  ;;  %2005 = vmatpush2.msra.mxu0 %v1334_v45  ;;  %v1479_v36 = vld [vmem:[#allocation8 + $0xf38] sm:$0xff]  ;;  %v1478_v37 = vld [vmem:[#allocation8 + $0xf30] sm:$0xff] }
 0x207   :  { %2024 = vmatpush1.msra.mxu1 %v1438_v46  ;;  %2087 = vmatprep.mubr.f32.mxu1 %v991_v17  ;;  %v1422_v17 = vld [vmem:[#allocation8 + $0xd70] sm:$0xff]  ;;  %v1475_v38 = vld [vmem:[#allocation8 + $0xf18] sm:$0xff] }
 0x208   :  { %2006 = vmatprep.subr.mxu0 %v1331_v47  ;;  %2025 = vmatprep.subr.mxu1 %v1435_v48  ;;  %v1474_v45 = vld [vmem:[#allocation8 + $0xf10] sm:$0xff]  ;;  %v1471_v46 = vld [vmem:[#allocation8 + $0xef8] sm:$0xff] }
 0x209   :  { %2007 = vmatpush2.msra.mxu0 %v1330_v49  ;;  %2026 = vmatpush1.msra.mxu1 %v1434_v50  ;;  %v1470_v47 = vld [vmem:[#allocation8 + $0xef0] sm:$0xff]  ;;  %v1467_v48 = vld [vmem:[#allocation8 + $0xed8] sm:$0xff] }
 0x20a   :  { %2008 = vmatprep.subr.mxu0 %v1327_v51  ;;  %2027 = vmatprep.subr.mxu1 %v1431_v52  ;;  %v1466_v49 = vld [vmem:[#allocation8 + $0xed0] sm:$0xff]  ;;  %v1463_v50 = vld [vmem:[#allocation8 + $0xeb8] sm:$0xff] }
 0x20b   :  { %2009 = vmatpush2.msra.mxu0 %v1326_v40  ;;  %2028 = vmatpush1.msra.mxu1 %v1430_v43  ;;  %v1462_v51 = vld [vmem:[#allocation8 + $0xeb0] sm:$0xff]  ;;  %v1459_v52 = vld [vmem:[#allocation8 + $0xe98] sm:$0xff] }
 0x20c   :  { %2010 = vmatprep.subr.mxu0 %v1323_v58  ;;  %2029 = vmatprep.subr.mxu1 %v1427_v4  ;;  %v1458_v40 = vld [vmem:[#allocation8 + $0xe90] sm:$0xff]  ;;  %v1455_v43 = vld [vmem:[#allocation8 + $0xe78] sm:$0xff] }
 0x20d   :  { %2011 = vmatpush2.msra.mxu0 %v1322_v54  ;;  %2030 = vmatpush1.msra.mxu1 %v1426_v55  ;;  %v1454_v58 = vld [vmem:[#allocation8 + $0xe70] sm:$0xff]  ;;  %v1451_v4 = vld [vmem:[#allocation8 + $0xe58] sm:$0xff] }
 0x20e   :  { %2012 = vmatprep.subr.mxu0 %v1319_v57  ;;  %2031 = vmatprep.subr.mxu1 %v1423_v59  ;;  %v1450_v54 = vld [vmem:[#allocation8 + $0xe50] sm:$0xff]  ;;  %v1447_v55 = vld [vmem:[#allocation8 + $0xe38] sm:$0xff] }
 0x20f   :  { %2013 = vmatpush2.msra.mxu0 %v1318_v10  ;;  %2032 = vmatpush1.msra.mxu1 %v1422_v17  ;;  %v1446_v57 = vld [vmem:[#allocation8 + $0xe30] sm:$0xff]  ;;  %v1443_v59 = vld [vmem:[#allocation8 + $0xe18] sm:$0xff] }
 0x210   :  { %2014 = vmatprep.subr.mxu0 %v1315_v12  ;;  %2033 = vmatprep.subr.mxu1 %v1419_v15  ;;  %v1442_v10 = vld [vmem:[#allocation8 + $0xe10] sm:$0xff]  ;;  %v2145_v17 = vld [vmem:[#allocation10 + $0xf8] sm:$0xff] }
 0x211   :  { %2015 = vmatpush2.msra.mxu0 %v1314_v61  ;;  %2034 = vmatpush1.msra.mxu1 %v1418_v31  ;;  %v2129_v12 = vld [vmem:[#allocation10 + $0x78] sm:$0xff]  ;;  %v2144_v15 = vld [vmem:[#allocation10 + $0xf0] sm:$0xff]  ;;  %v2143_v31 = vld [vmem:[#allocation10 + $0xe8] sm:$0xff] }
 0x212   :  { %2017 = vmatmul.mubr.f32.vlgmr.msra.gmra.mxu0 %v988_v33  ;;  %2035 = vmatprep.subr.mxu1 %v1415_v34  ;;  %v1390_v33 = vld [vmem:[#allocation8 + $0xc70] sm:$0xff]  ;;  %v2127_v34 = vld [vmem:[#allocation10 + $0x68] sm:$0xff]  ;;  %v2125_v62 = vld [vmem:[#allocation10 + $0x58] sm:$0xff] }
 0x213   :  { %2036 = vmatpush1.msra.mxu1 %v1414_v56  ;;  %2260 = vmatprep.subr.mxu0 %v2145_v17  ;;  %v2128_v61 = vld [vmem:[#allocation10 + $0x70] sm:$0xff]  ;;  %v2142_v56 = vld [vmem:[#allocation10 + $0xe0] sm:$0xff] }
 0x214   :  { %2037 = vmatprep.subr.mxu1 %v1411_v41  ;;  %2261 = vmatpush3.msra.mxu0 %v2129_v12  ;;  %v2126_v41 = vld [vmem:[#allocation10 + $0x60] sm:$0xff] }
 0x215   :  { %2038 = vmatpush1.msra.mxu1 %v1410_v42  ;;  %2262 = vmatprep.subr.mxu0 %v2144_v15  ;;  %v2141_v42 = vld [vmem:[#allocation10 + $0xd8] sm:$0xff] }
 0x216   :  { %2039 = vmatprep.subr.mxu1 %v1407_v63  ;;  %2263 = vmatpush3.msra.mxu0 %v2128_v61  ;;  %v2124_v63 = vld [vmem:[#allocation10 + $0x50] sm:$0xff] }
 0x217   :  { %2040 = vmatpush1.msra.mxu1 %v1406_v2  ;;  %2264 = vmatprep.subr.mxu0 %v2143_v31  ;;  %v2139_v2 = vld [vmem:[#allocation10 + $0xc8] sm:$0xff] }
 0x218   :  { %2041 = vmatprep.subr.mxu1 %v1403_v6  ;;  %2265 = vmatpush3.msra.mxu0 %v2127_v34  ;;  %v2123_v6 = vld [vmem:[#allocation10 + $0x48] sm:$0xff] }
 0x219   :  { %2042 = vmatpush1.msra.mxu1 %v1402_v7  ;;  %2266 = vmatprep.subr.mxu0 %v2142_v56  ;;  %v2138_v7 = vld [vmem:[#allocation10 + $0xc0] sm:$0xff] }
 0x21a   :  { %2043 = vmatprep.subr.mxu1 %v1399_v8  ;;  %2267 = vmatpush3.msra.mxu0 %v2126_v41  ;;  %v2122_v8 = vld [vmem:[#allocation10 + $0x40] sm:$0xff] }
 0x21b   :  { %2044 = vmatpush1.msra.mxu1 %v1398_v9  ;;  %2268 = vmatprep.subr.mxu0 %v2141_v42  ;;  %v2137_v9 = vld [vmem:[#allocation10 + $0xb8] sm:$0xff] }
 0x21c   :  { %2045 = vmatprep.subr.mxu1 %v1395_v11  ;;  %2269 = vmatpush3.msra.mxu0 %v2125_v62  ;;  %v2121_v11 = vld [vmem:[#allocation10 + $0x38] sm:$0xff] }
 0x21d   :  { %2046 = vmatpush1.msra.mxu1 %v1394_v13  ;;  %v2136_v13 = vld [vmem:[#allocation10 + $0xb0] sm:$0xff] }
 0x21e   :  { %2047 = vmatprep.subr.mxu1 %v1391_v44  ;;  %v2120_v44 = vld [vmem:[#allocation10 + $0x30] sm:$0xff] }
 0x21f   :  { %2048 = vmatpush1.msra.mxu1 %v1390_v33  ;;  %v2135_v33 = vld [vmem:[#allocation10 + $0xa8] sm:$0xff] }
 0x220   :  { %2049 = vmatprep.subr.mxu1 %v1387_v14  ;;  %v2119_v14 = vld [vmem:[#allocation10 + $0x28] sm:$0xff] }
 0x221   :  { %2050 = vmatpush1.msra.mxu1 %v1386_v16  ;;  %v2134_v16 = vld [vmem:[#allocation10 + $0xa0] sm:$0xff] }
 0x222   :  { %2051 = vmatprep.subr.mxu1 %v1383_v53  ;;  %v2118_v53 = vld [vmem:[#allocation10 + $0x20] sm:$0xff] }
 0x223   :  { %2052 = vmatpush1.msra.mxu1 %v1382_v18  ;;  %v2133_v18 = vld [vmem:[#allocation10 + $0x98] sm:$0xff] }
 0x224   :  { %2053 = vmatprep.subr.mxu1 %v1379_v19  ;;  %v2117_v19 = vld [vmem:[#allocation10 + $0x18] sm:$0xff] }
 0x225   :  { %2054 = vmatpush1.msra.mxu1 %v1378_v20  ;;  %v2132_v20 = vld [vmem:[#allocation10 + $0x90] sm:$0xff] }
 0x226   :  { %2055 = vmatprep.subr.mxu1 %v1503_v21  ;;  %v2116_v21 = vld [vmem:[#allocation10 + $0x10] sm:$0xff] }
 0x227   :  { %2056 = vmatpush2.msra.mxu1 %v1502_v22  ;;  %v2131_v22 = vld [vmem:[#allocation10 + $0x88] sm:$0xff] }
 0x228   :  { %2057 = vmatprep.subr.mxu1 %v1499_v27  ;;  %v2115_v27 = vld [vmem:[#allocation10 + $0x8] sm:$0xff] }
 0x229   :  { %2058 = vmatpush2.msra.mxu1 %v1498_v3  ;;  %v2130_v3 = vld [vmem:[#allocation10 + $0x80] sm:$0xff] }
 0x22a   :  { %2059 = vmatprep.subr.mxu1 %v1495_v23  ;;  %v2114_v23 = vld [vmem:[#allocation10] sm:$0xff] }
 0x22b   :  { %2060 = vmatpush2.msra.mxu1 %v1494_v60  ;;  %v1592_v60 = vpop.f32.mrf.mxu0 }
 0x22c   :  { %2061 = vmatprep.subr.mxu1 %v1491_v1 }
 0x22d   :  { %2062 = vmatpush2.msra.mxu1 %v1490_v24  ;;  %v1594_v1 = vpop.f32.mrf.mxu0 }
 0x22e   :  { %2063 = vmatprep.subr.mxu1 %v1487_v25 }
 0x22f   :  { %2064 = vmatpush2.msra.mxu1 %v1486_v26 }
 0x230   :  { %2065 = vmatprep.subr.mxu1 %v1483_v29  ;;  %v1504_v29 = vld [vmem:[#allocation11 + $0x8] sm:$0xf] }
 0x231   :  { %2066 = vmatpush2.msra.mxu1 %v1482_v35 }
 0x232   :  { %2067 = vmatprep.subr.mxu1 %v1479_v36 }
 0x233   :  { %2068 = vmatpush2.msra.mxu1 %v1478_v37 }
 0x234   :  { %2069 = vmatprep.subr.mxu1 %v1475_v38  ;;  %v1509_v38 = vrot.slane %v1504_v29, %v938_v30 }
 0x235   :  { %2070 = vmatpush2.msra.mxu1 %v1474_v45 }
 0x236   :  { %2071 = vmatprep.subr.mxu1 %v1471_v46  ;;  %v1513_v46 = vrot.slane %v1504_v29, %v942_v32 }
 0x237   :  { %2072 = vmatpush2.msra.mxu1 %v1470_v47  ;;  %v1517_v47 = vrot.slane %v1504_v29, %v946_v0 }
 0x238   :  { %2073 = vmatprep.subr.mxu1 %v1467_v48 }
 0x239   :  { %2074 = vmatpush2.msra.mxu1 %v1466_v49 }
 0x23a   :  { %2075 = vmatprep.subr.mxu1 %v1463_v50  ;;  %v1593_v50 = vadd.f32 %v1592_v60, %v1509_v38 }
 0x23b   :  { %2076 = vmatpush2.msra.mxu1 %v1462_v51  ;;  %v1521_v51 = vrot.slane %v1504_v29, %v950_v39 }
 0x23c   :  { %2077 = vmatprep.subr.mxu1 %v1459_v52 }
 0x23d   :  { %2078 = vmatpush2.msra.mxu1 %v1458_v40  ;;  %v1595_v40 = vadd.f32 %v1594_v1, %v1513_v46 }
 0x23e   :  { %2079 = vmatprep.subr.mxu1 %v1455_v43 }
 0x23f   :  { %2080 = vmatpush2.msra.mxu1 %v1454_v58 }
 0x240   :  { %2081 = vmatprep.subr.mxu1 %v1451_v4 }
 0x241   :  { %2082 = vmatpush2.msra.mxu1 %v1450_v54 }
 0x242   :  { %2083 = vmatprep.subr.mxu1 %v1447_v55  ;;  %v1663_v24 = vpop.f32.mrf.mxu1 }
 0x243   :  { %2084 = vmatpush2.msra.mxu1 %v1446_v57  ;;  %v1664_v43 = vadd.f32 %v1663_v24, %v1593_v50 }
 0x244   :  { %2085 = vmatprep.subr.mxu1 %v1443_v59  ;;  %v1665_v26 = vpop.f32.mrf.mxu1 }
 0x245   :  { %2086 = vmatpush2.msra.mxu1 %v1442_v10  ;;  %v1666_v54 = vadd.f32 %v1665_v26, %v1595_v40 }
 0x246   :  { %2088 = vmatmul.mubr.f32.vlgmr.msra.gmra.mxu1 %v990_v5  ;;  %v2140_v5 = vld [vmem:[#allocation10 + $0xd0] sm:$0xff] }
 0x247   :  { %2270 = vmatprep.subr.mxu0 %v2140_v5 }
 0x248   :  { %2271 = vmatpush3.msra.mxu0 %v2124_v63 }
 0x249   :  { %2272 = vmatprep.subr.mxu0 %v2139_v2 }
 0x24a   :  { %2273 = vmatpush3.msra.mxu0 %v2123_v6 }
 0x24b   :  { %2274 = vmatprep.subr.mxu0 %v2138_v7 }
 0x24c   :  { %2275 = vmatpush3.msra.mxu0 %v2122_v8 }
 0x24d   :  { %2276 = vmatprep.subr.mxu0 %v2137_v9  ;;  %v1734_v25 = vpop.f32.mrf.mxu0 }
 0x24e   :  { %2277 = vmatpush3.msra.mxu0 %v2121_v11  ;;  %v1735_v30 = vadd.f32 %v1734_v25, %v1664_v43 }
 0x24f   :  { %2278 = vmatprep.subr.mxu0 %v2136_v13  ;;  %v1736_v35 = vpop.f32.mrf.mxu0 }
 0x250   :  { %2279 = vmatpush3.msra.mxu0 %v2120_v44  ;;  %v1737_v32 = vadd.f32 %v1736_v35, %v1666_v54 }
 0x251   :  { %2280 = vmatprep.subr.mxu0 %v2135_v33 }
 0x252   :  { %2281 = vmatpush3.msra.mxu0 %v2119_v14 }
 0x253   :  { %2282 = vmatprep.subr.mxu0 %v2134_v16 }
 0x254   :  { %2283 = vmatpush3.msra.mxu0 %v2118_v53 }
 0x255   :  { %2284 = vmatprep.subr.mxu0 %v2133_v18 }
 0x256   :  { %2285 = vmatpush3.msra.mxu0 %v2117_v19 }
 0x257   :  { %2286 = vmatprep.subr.mxu0 %v2132_v20  ;;  %v2146_v20 = vld [vmem:[#allocation11 + $0xc] sm:$0x1] }
 0x258   :  { %2287 = vmatpush3.msra.mxu0 %v2116_v21 }
 0x259   :  { %2288 = vmatprep.subr.mxu0 %v2131_v22 }
 0x25a   :  { %2289 = vmatpush3.msra.mxu0 %v2115_v27 }
 0x25b   :  { %2290 = vmatprep.subr.mxu0 %v2130_v3 }
 0x25c   :  { %2291 = vmatpush3.msra.mxu0 %v2114_v23 }
 0x283   :  { %v1805_v36 = vpop.f32.mrf.mxu1 }
 0x284   :  { %v1806_v10 = vadd.f32 %v1805_v36, %v1735_v30 }
 0x285   :  { %v1807_v45 = vpop.f32.mrf.mxu1 }
 0x286   :  { %v1808_v15 = vadd.f32 %v1807_v45, %v1737_v32  ;;  %v2094_v39 = vmax.f32 %v1806_v10, 0.0 }
 0x288   :  { %v2095_v41 = vmax.f32 %v1808_v15, 0.0 }
 0x290   :  { %v1876_v37 = vpop.f32.mrf.mxu0 }
 0x291   :  { %v1877_v58 = vadd.f32 %v1876_v37, %v1517_v47 }
 0x292   :  { %v1878_v48 = vpop.f32.mrf.mxu0 }
 0x293   :  { %v1879_v55 = vadd.f32 %v1878_v48, %v1521_v51 }
 0x2c5   :  { %v1947_v49 = vpop.f32.mrf.mxu1 }
 0x2c6   :  { %v1948_v57 = vadd.f32 %v1947_v49, %v1877_v58 }
 0x2c7   :  { %v1949_v4 = vpop.f32.mrf.mxu1 }
 0x2c8   :  { %v1950_v17 = vadd.f32 %v1949_v4, %v1879_v55 }
 0x2d2   :  { %v2018_v52 = vpop.f32.mrf.mxu0 }
 0x2d3   :  { %v2019_v0 = vadd.f32 %v2018_v52, %v1948_v57 }
 0x2d4   :  { %v2020_v59 = vpop.f32.mrf.mxu0 }
 0x2d5   :  { %v2021_v61 = vadd.f32 %v2020_v59, %v1950_v17 }
 0x306   :  { %v2089_v12 = vpop.f32.mrf.mxu1 }
 0x307   :  { %v2090_v31 = vadd.f32 %v2089_v12, %v2019_v0 }
 0x308   :  { %v2091_v28 = vpop.f32.mrf.mxu1 }
 0x309   :  { %v2096_v34 = vmax.f32 %v2090_v31, 0.0  ;;  %v2092_v56 = vadd.f32 %v2091_v28, %v2021_v61 }
 0x30b   :  { %v2098_v42 = vadd.f32 %v2096_v34, %v2094_v39  ;;  %v2097_v62 = vmax.f32 %v2092_v56, 0.0 }
 0x30d   :  { %v2100_v5 = vrot.slane %v2098_v42, 4  ;;  %v2099_v63 = vadd.f32 %v2097_v62, %v2095_v41 }
 0x30f   :  { %v2101_v2 = vadd.f32 %v2100_v5, %v2098_v42  ;;  %v2106_v6 = vrot.slane %v2099_v63, 4 }
 0x311   :  { %v2102_v7 = vrot.slane %v2101_v2, 2  ;;  %v2107_v8 = vadd.f32 %v2106_v6, %v2099_v63 }
 0x313   :  { %v2103_v9 = vadd.f32 %v2102_v7, %v2101_v2  ;;  %v2108_v11 = vrot.slane %v2107_v8, 2 }
 0x315   :  { %v2104_v13 = vrot.slane %v2103_v9, 1  ;;  %v2109_v44 = vadd.f32 %v2108_v11, %v2107_v8 }
 0x317   :  { %v2110_v33 = vrot.slane %v2109_v44, 1  ;;  %v2105_v14 = vadd.f32 %v2104_v13, %v2103_v9 }
 0x319   :  { %v2111_v16 = vadd.f32 %v2110_v33, %v2109_v44  ;;  %v2112_v18 = vmul.f32 0.0625, %v2105_v14 }
 0x31b   :  { %v2113_v53 = vmul.f32 0.0625, %v2111_v16 }
 0x31d   :  { %2211 = vmatprep.mubr.f32.mxu0 %v2113_v53 }
 0x31e   :  { %2212 = vmatmul.mubr.f32.vlgmr.msra.gmra.mxu0 %v2112_v18 }
 0x3de   :  { %v2292_v19 = vpop.f32.mrf.mxu0 }
 0x3e0   :  { %v2293_v21 = vpop.f32.mrf.mxu0 }
 0x3e1   :  { %v2294_v22 = vadd.f32 %v2293_v21, %v2292_v19 }
 0x3e3   :  { %v2214_v27 = vadd.f32 %v2294_v22, %v2146_v20 }
 0x3e5   :  { %2217 = vst [vmem:[#allocation13] sm:$0x1] %v2214_v27 }
 0x3e6   :  { %2439 = shalt.err (!%p2436_p6)
}
 0x3e7   :  { %2227 = dma.vmem_to_hbm [thread:$0]  %s2225_s5, 16, %s2687_s6, [#allocation4]  }
 0x3e8   :  { %2456 = dma.done.wait [#allocation4], 16  }
 0x3e9   :  { %2457 = vsyncadd [#allocation4], 4294967280 }
 0x3ea   :  { %2231 = vsyncpa [#allocation3], 1 }
 0x3eb   :  { %2232 = vsyncpa [#allocation6], 1 }
 0x3ec   :  { %2233 = vsyncpa [#allocation9], 1 }
 0x3ed   :  { %2234 = vsyncpa [#allocation12], 1 }
 0x3ee   :  { %2235 = vsyncpa [#allocation4], 1 }

</bundles_post_ra>
